<compile_context>
chip_gen: v6e
topology: v6e:2x2x1
jax: 0.10.0
libtpu: 0.0.40
codegen_flags: <defaults>
</compile_context>

<pallas_src>
import functools

import jax
import jax.numpy as jnp
from jax import lax
from jax.experimental import pallas as pl
from jax.experimental.pallas import tpu as pltpu


def _round_up(x, m):
    return (x + m - 1) // m * m


def _conv_bn_relu_kernel(w_ref, x_ref, gb_ref, o_ref, acc_ref, *, eps, inv_p):
    # w_ref  : [C_pad, K]      conv weight (Cout x Cin_eff), matmul dtype
    # x_ref  : [K, P_pad]      pixels (Cin_eff x N*H*W), matmul dtype
    # gb_ref : [C_pad, 2]      column 0 = gamma, column 1 = beta (f32)
    # o_ref  : [C_pad, P_pad]  output (f32), already NCHW-ordered
    # acc_ref: [C_pad, P_pad]  f32 VMEM scratch for the matmul result

    # ---- (pruned, dilated) conv as one full-width MXU matmul, f32 accum ----
    acc_ref[...] = jnp.dot(w_ref[...], x_ref[...],
                           preferred_element_type=jnp.float32)
    acc = acc_ref[...]

    # ---- BatchNorm2d (training mode, biased variance), single pass ----
    # Reduction is over the pixel (lane) axis; zero-padded lanes contribute
    # nothing, and we divide by the real pixel count (inv_p = 1 / (N*H*W)).
    mean = jnp.sum(acc, axis=1, keepdims=True) * inv_p           # [C, 1]
    sumsq = jnp.sum(acc * acc, axis=1, keepdims=True) * inv_p    # [C, 1]
    var = sumsq - mean * mean
    inv_std = lax.rsqrt(var + eps)

    gb = gb_ref[...]                                             # [C, 2]
    scale = gb[:, 0:1] * inv_std                                 # gamma / std
    shift = gb[:, 1:2] - mean * scale                            # beta - mean*scale

    # ---- affine + ReLU ----
    o_ref[...] = jnp.maximum(acc * scale + shift, 0.0).astype(o_ref.dtype)


def _active_taps(h, w, kh, kw, padding, dilation):
    """Conv taps whose (dilated) receptive field intersects the real image."""
    taps = []
    for ky in range(kh):
        off_y = ky * dilation - padding
        y0, y1 = max(0, -off_y), min(h, h - off_y)
        if y1 <= y0:
            continue
        for kx in range(kw):
            off_x = kx * dilation - padding
            x0, x1 = max(0, -off_x), min(w, w - off_x)
            if x1 <= x0:
                continue
            taps.append((ky, kx, off_y, off_x, y0, y1, x0, x1))
    return taps


def conv_bn_relu(x_nchw, weight, gamma, beta, *, padding=36, dilation=36,
                 eps=1e-5, matmul_dtype=jnp.bfloat16):
    """x_nchw: [N, Cin, H, W]; weight: [Cout, Cin, KH, KW] (PyTorch layout)."""
    n, cin, h, w = x_nchw.shape
    cout, _, kh, kw = weight.shape

    taps = _active_taps(h, w, kh, kw, padding, dilation)
    assert taps, "conv output would be identically zero for this geometry"

    p_rows = n * h * w
    p_pad = _round_up(p_rows, 128)      # lane-dense output stores
    c_pad = _round_up(cout, 8)          # sublane-legal rows (no-op for 256)
    k_dim = len(taps) * cin             # contraction dim, left unpadded

    # ---- glue: single cast to matmul dtype, live taps only, no transposes ---
    x_cast = x_nchw.astype(matmul_dtype)
    x_taps, w_cols = [], []
    for (ky, kx, off_y, off_x, y0, y1, x0, x1) in taps:
        sl = lax.slice(x_cast,
                       (0, 0, y0 + off_y, x0 + off_x),
                       (n, cin, y1 + off_y, x1 + off_x))
        if (y0, h - y1, x0, w - x1) != (0, 0, 0, 0):
            sl = jnp.pad(sl, ((0, 0), (0, 0), (y0, h - y1), (x0, w - x1)))
        x_taps.append(sl)                                   # [N, Cin, H, W]
        w_cols.append(weight[:, :, ky, kx])                 # [Cout, Cin]

    x_full = x_taps[0] if len(x_taps) == 1 else jnp.concatenate(x_taps, axis=1)
    w2d = w_cols[0] if len(w_cols) == 1 else jnp.concatenate(w_cols, axis=1)

    if n == 1:
        x2d = x_full.reshape(k_dim, h * w)                  # free reshape
    else:
        x2d = jnp.transpose(x_full, (1, 0, 2, 3)).reshape(k_dim, p_rows)

    if p_pad != p_rows:
        x2d = jnp.pad(x2d, ((0, 0), (0, p_pad - p_rows)))   # zero lanes: stat-neutral

    w2d = w2d.astype(matmul_dtype)
    if c_pad != cout:
        w2d = jnp.pad(w2d, ((0, c_pad - cout), (0, 0)))

    gb = jnp.stack([gamma.astype(jnp.float32),
                    beta.astype(jnp.float32)], axis=-1)     # [Cout, 2]
    if c_pad != cout:
        gb = jnp.pad(gb, ((0, c_pad - cout), (0, 0)))

    kernel = functools.partial(_conv_bn_relu_kernel, eps=eps, inv_p=1.0 / p_rows)

    itemsize = jnp.dtype(matmul_dtype).itemsize
    bytes_accessed = (c_pad * k_dim * itemsize          # weight
                      + k_dim * p_pad * itemsize        # pixels
                      + c_pad * 2 * 4                   # gamma/beta
                      + c_pad * p_pad * 4)              # output

    out2d = pl.pallas_call(
        kernel,
        out_shape=jax.ShapeDtypeStruct((c_pad, p_pad), jnp.float32),
        grid_spec=pltpu.PrefetchScalarGridSpec(
            num_scalar_prefetch=0,
            grid=(1,),                                   # single full-width step
            in_specs=[
                pl.BlockSpec((c_pad, k_dim), lambda i: (0, 0)),
                pl.BlockSpec((k_dim, p_pad), lambda i: (0, 0)),
                pl.BlockSpec((c_pad, 2), lambda i: (0, 0)),
            ],
            out_specs=pl.BlockSpec((c_pad, p_pad), lambda i: (0, 0)),
            scratch_shapes=[pltpu.VMEM((c_pad, p_pad), jnp.float32)],
        ),
        compiler_params=pltpu.CompilerParams(
            dimension_semantics=("arbitrary",),
        ),
        cost_estimate=pl.CostEstimate(
            flops=2 * c_pad * k_dim * p_pad + 6 * c_pad * p_pad,
            transcendentals=c_pad,
            bytes_accessed=bytes_accessed,
        ),
    )(w2d, x2d, gb)

    # ---- glue: strip padding; output is already channel-major (NCHW) ----
    out = out2d[:cout, :p_rows]
    if n == 1:
        return out.reshape(1, cout, h, w)
    return jnp.transpose(out.reshape(cout, n, h, w), (1, 0, 2, 3))


def _reference(x_nchw, weight, gamma, beta, *, padding=36, dilation=36, eps=1e-5):
    """Pure-JAX reference: dilated conv + train-mode batchnorm + relu."""
    x_nhwc = jnp.transpose(x_nchw, (0, 2, 3, 1))
    w_hwio = jnp.transpose(weight, (2, 3, 1, 0))
    y = lax.conv_general_dilated(
        x_nhwc, w_hwio,
        window_strides=(1, 1),
        padding=((padding, padding), (padding, padding)),
        rhs_dilation=(dilation, dilation),
        dimension_numbers=("NHWC", "HWIO", "NHWC"),
    )
    mean = jnp.mean(y, axis=(0, 1, 2), keepdims=True)
    var = jnp.mean((y - mean) ** 2, axis=(0, 1, 2), keepdims=True)
    y = (y - mean) * lax.rsqrt(var + eps) * gamma + beta
    y = jnp.maximum(y, 0.0)
    return jnp.transpose(y, (0, 3, 1, 2))


if __name__ == "__main__":
    # Small shapes consistent with the module (orig: 1x960x14x14 -> 1x256x14x14):
    # same spatial geometry (so the padding/dilation zero-tap pruning applies
    # exactly), reduced input channel count.
    N, CIN, COUT, H, W = 1, 128, 256, 14, 14
    KH = KW = 3
    PADDING = DILATION = 36

    key = jax.random.PRNGKey(0)
    kx_, kw_, kg_, kb_ = jax.random.split(key, 4)
    x = jax.random.normal(kx_, (N, CIN, H, W), dtype=jnp.float32)
    weight = jax.random.normal(kw_, (COUT, CIN, KH, KW), dtype=jnp.float32) * 0.05
    gamma = 1.0 + 0.1 * jax.random.normal(kg_, (COUT,), dtype=jnp.float32)
    beta = 0.1 * jax.random.normal(kb_, (COUT,), dtype=jnp.float32)

    ref = _reference(x, weight, gamma, beta,
                     padding=PADDING, dilation=DILATION, eps=1e-5)

    # Exact f32 path (tight tolerance).
    out_f32 = conv_bn_relu(x, weight, gamma, beta, padding=PADDING,
                           dilation=DILATION, eps=1e-5,
                           matmul_dtype=jnp.float32)
    out_f32 = jax.block_until_ready(out_f32)
    assert out_f32.shape == (N, COUT, H, W), out_f32.shape
    assert jnp.allclose(out_f32, ref, atol=3e-4, rtol=3e-4), \
        float(jnp.max(jnp.abs(out_f32 - ref)))

    # bf16 matmul-operand path (default; production recommendation for v6e/v7x).
    out_bf16 = conv_bn_relu(x, weight, gamma, beta, padding=PADDING,
                            dilation=DILATION, eps=1e-5)
    out_bf16 = jax.block_until_ready(out_bf16)
    assert out_bf16.shape == (N, COUT, H, W), out_bf16.shape
    assert jnp.allclose(out_bf16, ref, atol=3e-2, rtol=3e-2), \
        float(jnp.max(jnp.abs(out_bf16 - ref)))

    print("KERNEL_OK")
</pallas_src>

<mosaic_0001>
module attributes {stable_mosaic.version = 11 : i64} {
  func.func @_conv_bn_relu_kernel(%arg0: i32, %arg1: memref<256x128xf32, #tpu.memory_space<vmem>>, %arg2: memref<128x256xf32, #tpu.memory_space<vmem>>, %arg3: memref<256x2xf32, #tpu.memory_space<vmem>>, %arg4: memref<256x256xf32, #tpu.memory_space<vmem>>, %arg5: memref<256x256xf32, #tpu.memory_space<vmem>>) attributes {dimension_semantics = [#tpu.dimension_semantics<arbitrary>], iteration_bounds = array<i64: 1>, scalar_prefetch = 0 : i64, scratch_operands = 1 : i64, tpu.core_type = #tpu.core_type<tc>, window_params = [{pipeline_mode = #tpu.pipeline_mode<synchronous>, transform_indices = @transform_0, window_bounds = array<i64: 256, 128>}, {pipeline_mode = #tpu.pipeline_mode<synchronous>, transform_indices = @transform_1, window_bounds = array<i64: 128, 256>}, {pipeline_mode = #tpu.pipeline_mode<synchronous>, transform_indices = @transform_2, window_bounds = array<i64: 256, 2>}, {pipeline_mode = #tpu.pipeline_mode<synchronous>, transform_indices = @transform_3, window_bounds = array<i64: 256, 256>}]} {
    %c0 = arith.constant 0 : index
    %c0_0 = arith.constant 0 : index
    %0 = vector.load %arg1[%c0, %c0_0] : memref<256x128xf32, #tpu.memory_space<vmem>>, vector<256x128xf32>
    %c0_1 = arith.constant 0 : index
    %c0_2 = arith.constant 0 : index
    %1 = vector.load %arg2[%c0_1, %c0_2] : memref<128x256xf32, #tpu.memory_space<vmem>>, vector<128x256xf32>
    %cst = arith.constant dense<0.000000e+00> : vector<256x256xf32>
    %2 = tpu.matmul %0, %1, %cst {dimension_numbers = #tpu.dot_dimension_numbers<[1], [0], [0], [1], [0, 0, 1, 1], [], []>} : vector<256x128xf32>, vector<128x256xf32>, vector<256x256xf32> -> vector<256x256xf32>
    %c0_3 = arith.constant 0 : index
    %c0_4 = arith.constant 0 : index
    %3 = vector.load %arg5[%c0_3, %c0_4] : memref<256x256xf32, #tpu.memory_space<vmem>>, vector<256x256xf32>
    tpu.vector_store %arg5[%c0_3, %c0_4], %2 {strides = array<i32>} : memref<256x256xf32, #tpu.memory_space<vmem>>, vector<256x256xf32>,
    %c0_5 = arith.constant 0 : index
    %c0_6 = arith.constant 0 : index
    %4 = vector.load %arg5[%c0_5, %c0_6] : memref<256x256xf32, #tpu.memory_space<vmem>>, vector<256x256xf32>
    %cst_7 = arith.constant dense<0.000000e+00> : vector<256xf32>
    %5 = vector.multi_reduction <add>, %4, %cst_7 [1] : vector<256x256xf32> to vector<256xf32>
    %6 = vector.shape_cast %5 : vector<256xf32> to vector<256x1xf32>
    %cst_8 = arith.constant 0.00510204071 : f32
    %7 = vector.broadcast %cst_8 : f32 to vector<256x1xf32>
    %8 = arith.mulf %6, %7 : vector<256x1xf32>
    %9 = arith.mulf %4, %4 : vector<256x256xf32>
    %cst_9 = arith.constant dense<0.000000e+00> : vector<256xf32>
    %10 = vector.multi_reduction <add>, %9, %cst_9 [1] : vector<256x256xf32> to vector<256xf32>
    %11 = vector.shape_cast %10 : vector<256xf32> to vector<256x1xf32>
    %cst_10 = arith.constant 0.00510204071 : f32
    %12 = vector.broadcast %cst_10 : f32 to vector<256x1xf32>
    %13 = arith.mulf %11, %12 : vector<256x1xf32>
    %14 = arith.mulf %8, %8 : vector<256x1xf32>
    %15 = arith.subf %13, %14 : vector<256x1xf32>
    %cst_11 = arith.constant 9.99999974E-6 : f32
    %16 = vector.broadcast %cst_11 : f32 to vector<256x1xf32>
    %17 = arith.addf %15, %16 : vector<256x1xf32>
    %18 = math.rsqrt %17 : vector<256x1xf32>
    %c0_12 = arith.constant 0 : index
    %c0_13 = arith.constant 0 : index
    %19 = vector.load %arg3[%c0_12, %c0_13] : memref<256x2xf32, #tpu.memory_space<vmem>>, vector<256x2xf32>
    %20 = vector.extract_strided_slice %19 {offsets = [0, 0], sizes = [256, 1], strides = [1, 1]} : vector<256x2xf32> to vector<256x1xf32>
    %21 = arith.mulf %20, %18 : vector<256x1xf32>
    %22 = vector.extract_strided_slice %19 {offsets = [0, 1], sizes = [256, 1], strides = [1, 1]} : vector<256x2xf32> to vector<256x1xf32>
    %23 = arith.mulf %8, %21 : vector<256x1xf32>
    %24 = arith.subf %22, %23 : vector<256x1xf32>
    %25 = vector.broadcast %21 : vector<256x1xf32> to vector<256x256xf32>
    %26 = arith.mulf %4, %25 : vector<256x256xf32>
    %27 = vector.broadcast %24 : vector<256x1xf32> to vector<256x256xf32>
    %28 = arith.addf %26, %27 : vector<256x256xf32>
    %cst_14 = arith.constant 0.000000e+00 : f32
    %29 = vector.broadcast %cst_14 : f32 to vector<256x256xf32>
    %30 = arith.maximumf %28, %29 : vector<256x256xf32>
    %c0_15 = arith.constant 0 : index
    %c0_16 = arith.constant 0 : index
    %31 = vector.load %arg4[%c0_15, %c0_16] : memref<256x256xf32, #tpu.memory_space<vmem>>, vector<256x256xf32>
    tpu.vector_store %arg4[%c0_15, %c0_16], %30 {strides = array<i32>} : memref<256x256xf32, #tpu.memory_space<vmem>>, vector<256x256xf32>,
    return
  }
  func.func @transform_0(%arg0: i32) -> (i32, i32) {
    %c0_i32 = arith.constant 0 : i32
    %c0_i32_0 = arith.constant 0 : i32
    %c0_i32_1 = arith.constant 0 : i32
    return %c0_i32, %c0_i32_0 : i32, i32
  }
  func.func @transform_1(%arg0: i32) -> (i32, i32) {
    %c0_i32 = arith.constant 0 : i32
    %c0_i32_0 = arith.constant 0 : i32
    %c0_i32_1 = arith.constant 0 : i32
    return %c0_i32, %c0_i32_0 : i32, i32
  }
  func.func @transform_2(%arg0: i32) -> (i32, i32) {
    %c0_i32 = arith.constant 0 : i32
    %c0_i32_0 = arith.constant 0 : i32
    %c0_i32_1 = arith.constant 0 : i32
    return %c0_i32, %c0_i32_0 : i32, i32
  }
  func.func @transform_3(%arg0: i32) -> (i32, i32) {
    %c0_i32 = arith.constant 0 : i32
    %c0_i32_0 = arith.constant 0 : i32
    %c0_i32_1 = arith.constant 0 : i32
    return %c0_i32, %c0_i32_0 : i32, i32
  }
}

</mosaic_0001>

<bundles_post_ra>
// kernel: tpu_custom_call.1
= control target key start
LH: loop header
LB: loop body
LE: loop exit
PB: predicated region body
PF: predicated region fallthrough
CT: control target
= control target key end

     0   :  { %8 = vsyncpa [#allocation4], 0  ;;  %s3018_s0 = inlined_call_operand.vmem [shape: f32[256,128], index: 0, kind: input, shape index: {}]   ;;  %s3019_s1 = inlined_call_operand.hbm [shape: f32[128,256], index: 1, kind: input, shape index: {}]   ;;  %s3020_s2 = inlined_call_operand.vmem [shape: f32[256,2], index: 2, kind: input, shape index: {}]   ;;  %s3021_s3 = inlined_call_operand.hbm [shape: f32[256,256], index: 3, kind: output, shape index: {}]  }
   0x1   :  { %9 = vsyncpa [#allocation5], 0  ;;  %s1927_s12 = smov [#allocation3]  }
   0x2   :  { %s17_s13 = sshll.u32 %s1927_s12, 4  ;;  %s18_s13 = int_to_ptr.vmem [resolvable:$true] %s17_s13 }
   0x3   :  { %s1891_s14 = scalar_lea.vmem %s18_s13, 4096  ;;  %p1896_p1 = scmp.lt.s32.totalorder %s18_s13, %s18_s13 }
   0x4   :  { %p1892_p0 = scmp.ne.s32.totalorder %s18_s13, %s1891_s14  ;;  %p1897_p2 = scmp.lt.s32.totalorder %s1891_s14, %s1891_s14 }
   0x6   :  { %p1898_p3 = por %p1897_p2, %p1896_p1 }
   0x8   :  { %p1899_p4 = pnand %p1898_p3, %p1892_p0 }
   0xa   :  { %1902 = shalt.err (!%p1899_p4)
}
   0xb   :  { %s1928_s15 = smov 256   ;;  %s1929_s16 = smov 16  }
   0xc   :  { %23 = dma.hbm_to_vmem [thread:$0]  %s3019_s1, 4096, %s18_s13, [#allocation4], %s1928_s15, %s1928_s15, %s1929_s16  }
   0xd   :  { %1923 = dma.done.wait [#allocation4], 4096  }
   0xe   :  { %1924 = vsyncadd [#allocation4], 4294963200  ;;  %v1930_v0 = vmov 0.0   ;;  %v92_v1 = vld [vmem:[#allocation3 + $0xf8] sm:$0xff]  ;;  %v91_v2 = vld [vmem:[#allocation3 + $0xf0] sm:$0xff]  ;;  %s1932_s6 = smov 1  }
   0xf   :  { %157 = vmatprep.mubr.f32.mxu0 %v1930_v0  ;;  %253 = vmatprep.mubr.f32.mxu1 %v1930_v0  ;;  %v90_v3 = vld [vmem:[#allocation3 + $0xe8] sm:$0xff]  ;;  %v89_v4 = vld [vmem:[#allocation3 + $0xe0] sm:$0xff]  ;;  %v88_v5 = vld [vmem:[#allocation3 + $0xd8] sm:$0xff] }
  0x10   :  { %93 = vmatprep.subr.mxu0 %v92_v1  ;;  %1775 = vmatprep.subr.mxu1 %v92_v1  ;;  %v87_v6 = vld [vmem:[#allocation3 + $0xd0] sm:$0xff]  ;;  %v86_v7 = vld [vmem:[#allocation3 + $0xc8] sm:$0xff]  ;;  %v85_v8 = vld [vmem:[#allocation3 + $0xc0] sm:$0xff] }
  0x11   :  { %94 = vmatpush1.msra.mxu0 %v91_v2  ;;  %1791 = vmatpush1.msra.mxu1 %v91_v2  ;;  %v84_v9 = vld [vmem:[#allocation3 + $0xb8] sm:$0xff]  ;;  %v83_v10 = vld [vmem:[#allocation3 + $0xb0] sm:$0xff]  ;;  %v82_v11 = vld [vmem:[#allocation3 + $0xa8] sm:$0xff] }
  0x12   :  { %95 = vmatprep.subr.mxu0 %v90_v3  ;;  %1776 = vmatprep.subr.mxu1 %v90_v3  ;;  %v81_v12 = vld [vmem:[#allocation3 + $0xa0] sm:$0xff]  ;;  %v80_v13 = vld [vmem:[#allocation3 + $0x98] sm:$0xff]  ;;  %v79_v14 = vld [vmem:[#allocation3 + $0x90] sm:$0xff] }
  0x13   :  { %96 = vmatpush1.msra.mxu0 %v89_v4  ;;  %1792 = vmatpush1.msra.mxu1 %v89_v4  ;;  %v78_v15 = vld [vmem:[#allocation3 + $0x88] sm:$0xff]  ;;  %v77_v16 = vld [vmem:[#allocation3 + $0x80] sm:$0xff]  ;;  %v76_v17 = vld [vmem:[#allocation3 + $0x78] sm:$0xff] }
  0x14   :  { %97 = vmatprep.subr.mxu0 %v88_v5  ;;  %1777 = vmatprep.subr.mxu1 %v88_v5  ;;  %v75_v18 = vld [vmem:[#allocation3 + $0x70] sm:$0xff]  ;;  %v74_v19 = vld [vmem:[#allocation3 + $0x68] sm:$0xff]  ;;  %v73_v20 = vld [vmem:[#allocation3 + $0x60] sm:$0xff] }
  0x15   :  { %98 = vmatpush1.msra.mxu0 %v87_v6  ;;  %1793 = vmatpush1.msra.mxu1 %v87_v6  ;;  %v72_v21 = vld [vmem:[#allocation3 + $0x58] sm:$0xff]  ;;  %v71_v22 = vld [vmem:[#allocation3 + $0x50] sm:$0xff]  ;;  %v70_v23 = vld [vmem:[#allocation3 + $0x48] sm:$0xff] }
  0x16   :  { %99 = vmatprep.subr.mxu0 %v86_v7  ;;  %1778 = vmatprep.subr.mxu1 %v86_v7  ;;  %v69_v24 = vld [vmem:[#allocation3 + $0x40] sm:$0xff]  ;;  %v68_v25 = vld [vmem:[#allocation3 + $0x38] sm:$0xff]  ;;  %v67_v26 = vld [vmem:[#allocation3 + $0x30] sm:$0xff] }
  0x17   :  { %100 = vmatpush1.msra.mxu0 %v85_v8  ;;  %1794 = vmatpush1.msra.mxu1 %v85_v8  ;;  %v66_v27 = vld [vmem:[#allocation3 + $0x28] sm:$0xff]  ;;  %v65_v28 = vld [vmem:[#allocation3 + $0x20] sm:$0xff]  ;;  %v64_v29 = vld [vmem:[#allocation3 + $0x18] sm:$0xff] }
  0x18   :  { %101 = vmatprep.subr.mxu0 %v84_v9  ;;  %1779 = vmatprep.subr.mxu1 %v84_v9  ;;  %v63_v30 = vld [vmem:[#allocation3 + $0x10] sm:$0xff]  ;;  %v62_v31 = vld [vmem:[#allocation3 + $0x8] sm:$0xff]  ;;  %v61_v32 = vld [vmem:[#allocation3] sm:$0xff] }
  0x19   :  { %102 = vmatpush1.msra.mxu0 %v83_v10  ;;  %1795 = vmatpush1.msra.mxu1 %v83_v10  ;;  %v29_v33 = vld [vmem:[%s3018_s0] sm:$0xff]  ;;  %v46_v35 = vld [vmem:[%s3018_s0 + $0x88] sm:$0xff]  ;;  %v31_v37 = vld [vmem:[%s3018_s0 + $0x10] sm:$0xff] }
  0x1a   :  { %103 = vmatprep.subr.mxu0 %v82_v11  ;;  %1780 = vmatprep.subr.mxu1 %v82_v11  ;;  %v45_v34 = vld [vmem:[%s3018_s0 + $0x80] sm:$0xff]  ;;  %v30_v36 = vld [vmem:[%s3018_s0 + $0x8] sm:$0xff]  ;;  %v47_v38 = vld [vmem:[%s3018_s0 + $0x90] sm:$0xff] }
  0x1b   :  { %104 = vmatpush1.msra.mxu0 %v81_v12  ;;  %1796 = vmatpush1.msra.mxu1 %v81_v12  ;;  %v32_v39 = vld [vmem:[%s3018_s0 + $0x18] sm:$0xff]  ;;  %v33_v41 = vld [vmem:[%s3018_s0 + $0x20] sm:$0xff]  ;;  %v34_v43 = vld [vmem:[%s3018_s0 + $0x28] sm:$0xff] }
  0x1c   :  { %105 = vmatprep.subr.mxu0 %v80_v13  ;;  %1781 = vmatprep.subr.mxu1 %v80_v13  ;;  %v48_v40 = vld [vmem:[%s3018_s0 + $0x98] sm:$0xff]  ;;  %v49_v42 = vld [vmem:[%s3018_s0 + $0xa0] sm:$0xff]  ;;  %v50_v44 = vld [vmem:[%s3018_s0 + $0xa8] sm:$0xff] }
  0x1d   :  { %106 = vmatpush1.msra.mxu0 %v79_v14  ;;  %1797 = vmatpush1.msra.mxu1 %v79_v14  ;;  %v35_v45 = vld [vmem:[%s3018_s0 + $0x30] sm:$0xff]  ;;  %v36_v47 = vld [vmem:[%s3018_s0 + $0x38] sm:$0xff]  ;;  %v37_v49 = vld [vmem:[%s3018_s0 + $0x40] sm:$0xff] }
  0x1e   :  { %107 = vmatprep.subr.mxu0 %v78_v15  ;;  %1782 = vmatprep.subr.mxu1 %v78_v15  ;;  %v51_v46 = vld [vmem:[%s3018_s0 + $0xb0] sm:$0xff]  ;;  %v52_v48 = vld [vmem:[%s3018_s0 + $0xb8] sm:$0xff]  ;;  %v53_v50 = vld [vmem:[%s3018_s0 + $0xc0] sm:$0xff] }
  0x1f   :  { %108 = vmatpush1.msra.mxu0 %v77_v16  ;;  %1798 = vmatpush1.msra.mxu1 %v77_v16  ;;  %v38_v51 = vld [vmem:[%s3018_s0 + $0x48] sm:$0xff]  ;;  %v39_v53 = vld [vmem:[%s3018_s0 + $0x50] sm:$0xff]  ;;  %v40_v55 = vld [vmem:[%s3018_s0 + $0x58] sm:$0xff] }
  0x20   :  { %109 = vmatprep.subr.mxu0 %v76_v17  ;;  %1783 = vmatprep.subr.mxu1 %v76_v17  ;;  %v54_v52 = vld [vmem:[%s3018_s0 + $0xc8] sm:$0xff]  ;;  %v55_v54 = vld [vmem:[%s3018_s0 + $0xd0] sm:$0xff]  ;;  %v56_v56 = vld [vmem:[%s3018_s0 + $0xd8] sm:$0xff] }
  0x21   :  { %110 = vmatpush1.msra.mxu0 %v75_v18  ;;  %1799 = vmatpush1.msra.mxu1 %v75_v18  ;;  %v41_v57 = vld [vmem:[%s3018_s0 + $0x60] sm:$0xff]  ;;  %v42_v59 = vld [vmem:[%s3018_s0 + $0x68] sm:$0xff]  ;;  %v43_v61 = vld [vmem:[%s3018_s0 + $0x70] sm:$0xff] }
  0x22   :  { %111 = vmatprep.subr.mxu0 %v74_v19  ;;  %1784 = vmatprep.subr.mxu1 %v74_v19  ;;  %v57_v58 = vld [vmem:[%s3018_s0 + $0xe0] sm:$0xff]  ;;  %v58_v60 = vld [vmem:[%s3018_s0 + $0xe8] sm:$0xff]  ;;  %v59_v62 = vld [vmem:[%s3018_s0 + $0xf0] sm:$0xff] }
  0x23   :  { %112 = vmatpush1.msra.mxu0 %v73_v20  ;;  %1800 = vmatpush1.msra.mxu1 %v73_v20  ;;  %v44_v63 = vld [vmem:[%s3018_s0 + $0x78] sm:$0xff] }
  0x24   :  { %113 = vmatprep.subr.mxu0 %v72_v21  ;;  %1785 = vmatprep.subr.mxu1 %v72_v21  ;;  %v60_v1 = vld [vmem:[%s3018_s0 + $0xf8] sm:$0xff] }
  0x25   :  { %114 = vmatpush1.msra.mxu0 %v71_v22  ;;  %1801 = vmatpush1.msra.mxu1 %v71_v22 }
  0x26   :  { %115 = vmatprep.subr.mxu0 %v70_v23  ;;  %1786 = vmatprep.subr.mxu1 %v70_v23 }
  0x27   :  { %116 = vmatpush1.msra.mxu0 %v69_v24  ;;  %1802 = vmatpush1.msra.mxu1 %v69_v24 }
  0x28   :  { %117 = vmatprep.subr.mxu0 %v68_v25  ;;  %1787 = vmatprep.subr.mxu1 %v68_v25 }
  0x29   :  { %118 = vmatpush1.msra.mxu0 %v67_v26  ;;  %1803 = vmatpush1.msra.mxu1 %v67_v26 }
  0x2a   :  { %119 = vmatprep.subr.mxu0 %v66_v27  ;;  %1788 = vmatprep.subr.mxu1 %v66_v27 }
  0x2b   :  { %120 = vmatpush1.msra.mxu0 %v65_v28  ;;  %1804 = vmatpush1.msra.mxu1 %v65_v28 }
  0x2c   :  { %121 = vmatprep.subr.mxu0 %v64_v29  ;;  %1789 = vmatprep.subr.mxu1 %v64_v29 }
  0x2d   :  { %122 = vmatpush1.msra.mxu0 %v63_v30  ;;  %1805 = vmatpush1.msra.mxu1 %v63_v30 }
  0x2e   :  { %123 = vmatprep.subr.mxu0 %v62_v31  ;;  %1790 = vmatprep.subr.mxu1 %v62_v31 }
  0x2f   :  { %124 = vmatpush1.msra.mxu0 %v61_v32  ;;  %1806 = vmatpush1.msra.mxu1 %v61_v32 }
  0x30   :  { %158 = vmatmul.mubr.f32.vlgmr.msra.gmra.mxu0 %v29_v33  ;;  %254 = vmatmul.mubr.f32.vlgmr.msra.gmra.mxu1 %v45_v34 }
  0x31   :  { %259 = vmatprep.mubr.f32.mxu1 %v1930_v0  ;;  %163 = vmatprep.mubr.f32.mxu0 %v1930_v0 }
  0x34   :  { %260 = vmatmul.mubr.f32.gmra.mxu1 %v46_v35  ;;  %164 = vmatmul.mubr.f32.gmra.mxu0 %v30_v36 }
  0x35   :  { %169 = vmatprep.mubr.f32.mxu0 %v1930_v0  ;;  %265 = vmatprep.mubr.f32.mxu1 %v1930_v0 }
  0x38   :  { %170 = vmatmul.mubr.f32.gmra.mxu0 %v31_v37  ;;  %266 = vmatmul.mubr.f32.gmra.mxu1 %v47_v38 }
  0x39   :  { %175 = vmatprep.mubr.f32.mxu0 %v1930_v0  ;;  %271 = vmatprep.mubr.f32.mxu1 %v1930_v0 }
  0x3c   :  { %176 = vmatmul.mubr.f32.gmra.mxu0 %v32_v39  ;;  %272 = vmatmul.mubr.f32.gmra.mxu1 %v48_v40 }
  0x3d   :  { %181 = vmatprep.mubr.f32.mxu0 %v1930_v0  ;;  %277 = vmatprep.mubr.f32.mxu1 %v1930_v0 }
  0x40   :  { %182 = vmatmul.mubr.f32.gmra.mxu0 %v33_v41  ;;  %278 = vmatmul.mubr.f32.gmra.mxu1 %v49_v42 }
  0x41   :  { %187 = vmatprep.mubr.f32.mxu0 %v1930_v0  ;;  %283 = vmatprep.mubr.f32.mxu1 %v1930_v0 }
  0x44   :  { %188 = vmatmul.mubr.f32.gmra.mxu0 %v34_v43  ;;  %284 = vmatmul.mubr.f32.gmra.mxu1 %v50_v44 }
  0x45   :  { %193 = vmatprep.mubr.f32.mxu0 %v1930_v0  ;;  %289 = vmatprep.mubr.f32.mxu1 %v1930_v0 }
  0x48   :  { %194 = vmatmul.mubr.f32.gmra.mxu0 %v35_v45  ;;  %290 = vmatmul.mubr.f32.gmra.mxu1 %v51_v46 }
  0x49   :  { %199 = vmatprep.mubr.f32.mxu0 %v1930_v0  ;;  %295 = vmatprep.mubr.f32.mxu1 %v1930_v0 }
  0x4c   :  { %200 = vmatmul.mubr.f32.gmra.mxu0 %v36_v47  ;;  %296 = vmatmul.mubr.f32.gmra.mxu1 %v52_v48 }
  0x4d   :  { %205 = vmatprep.mubr.f32.mxu0 %v1930_v0  ;;  %301 = vmatprep.mubr.f32.mxu1 %v1930_v0 }
  0x50   :  { %206 = vmatmul.mubr.f32.gmra.mxu0 %v37_v49  ;;  %302 = vmatmul.mubr.f32.gmra.mxu1 %v53_v50 }
  0x51   :  { %211 = vmatprep.mubr.f32.mxu0 %v1930_v0  ;;  %307 = vmatprep.mubr.f32.mxu1 %v1930_v0 }
  0x54   :  { %212 = vmatmul.mubr.f32.gmra.mxu0 %v38_v51  ;;  %308 = vmatmul.mubr.f32.gmra.mxu1 %v54_v52 }
  0x55   :  { %217 = vmatprep.mubr.f32.mxu0 %v1930_v0  ;;  %313 = vmatprep.mubr.f32.mxu1 %v1930_v0 }
  0x58   :  { %218 = vmatmul.mubr.f32.gmra.mxu0 %v39_v53  ;;  %314 = vmatmul.mubr.f32.gmra.mxu1 %v55_v54 }
  0x59   :  { %223 = vmatprep.mubr.f32.mxu0 %v1930_v0  ;;  %319 = vmatprep.mubr.f32.mxu1 %v1930_v0 }
  0x5c   :  { %224 = vmatmul.mubr.f32.gmra.mxu0 %v40_v55  ;;  %320 = vmatmul.mubr.f32.gmra.mxu1 %v56_v56 }
  0x5d   :  { %229 = vmatprep.mubr.f32.mxu0 %v1930_v0  ;;  %325 = vmatprep.mubr.f32.mxu1 %v1930_v0 }
  0x60   :  { %230 = vmatmul.mubr.f32.gmra.mxu0 %v41_v57  ;;  %326 = vmatmul.mubr.f32.gmra.mxu1 %v57_v58 }
  0x61   :  { %235 = vmatprep.mubr.f32.mxu0 %v1930_v0  ;;  %331 = vmatprep.mubr.f32.mxu1 %v1930_v0 }
  0x64   :  { %236 = vmatmul.mubr.f32.gmra.mxu0 %v42_v59  ;;  %332 = vmatmul.mubr.f32.gmra.mxu1 %v58_v60 }
  0x65   :  { %241 = vmatprep.mubr.f32.mxu0 %v1930_v0  ;;  %337 = vmatprep.mubr.f32.mxu1 %v1930_v0 }
  0x68   :  { %242 = vmatmul.mubr.f32.gmra.mxu0 %v43_v61  ;;  %338 = vmatmul.mubr.f32.gmra.mxu1 %v59_v62 }
  0x69   :  { %247 = vmatprep.mubr.f32.mxu0 %v1930_v0  ;;  %343 = vmatprep.mubr.f32.mxu1 %v1930_v0 }
  0x6c   :  { %248 = vmatmul.mubr.f32.gmra.mxu0 %v44_v63  ;;  %344 = vmatmul.mubr.f32.gmra.mxu1 %v60_v1 }
  0xf0   :  { %v2089_v2 = vpop.f32.mrf.mxu0  ;;  %v2091_v3 = vpop.f32.mrf.mxu1 }
  0xf1   :  { %v606_v15 = vmul.f32 %v2089_v2, %v2089_v2  ;;  %v638_v23 = vmul.f32 %v2091_v3, %v2091_v3 }
  0xf2   :  { %v2093_v4 = vpop.f32.mrf.mxu0  ;;  %v2095_v5 = vpop.f32.mrf.mxu1 }
  0xf3   :  { %v478_v6 = vadd.f32 %v2093_v4, %v2089_v2  ;;  %v526_v12 = vadd.f32 %v2095_v5, %v2091_v3  ;;  %v607_v13 = vmul.f32 %v2093_v4, %v2093_v4  ;;  %v639_v24 = vmul.f32 %v2095_v5, %v2095_v5 }
  0xf4   :  { %v2099_v7 = vpop.f32.mrf.mxu1  ;;  %v2101_v0 = vpop.f32.mrf.mxu0 }
  0xf5   :  { %479 = vadd.xlane.f32.xlu0 %v478_v6  ;;  %v608_v8 = vmul.f32 %v2101_v0, %v2101_v0  ;;  %v640_v18 = vmul.f32 %v2099_v7, %v2099_v7  ;;  %v670_v22 = vadd.f32 %v607_v13, %v606_v15  ;;  %v718_v28 = vadd.f32 %v639_v24, %v638_v23 }
  0xf6   :  { %v2105_v9 = vpop.f32.mrf.mxu1  ;;  %v2107_v10 = vpop.f32.mrf.mxu0  ;;  %v1931_v24 = vmov 0  }
  0xf7   :  { %v529_v11 = vadd.f32 %v2105_v9, %v2099_v7  ;;  %v609_v14 = vmul.f32 %v2107_v10, %v2107_v10  ;;  %v641_v19 = vmul.f32 %v2105_v9, %v2105_v9  ;;  %v481_v32 = vadd.f32 %v2107_v10, %v2101_v0  ;;  %1815 = vset.pattern.permute.xlu0 %v1931_v24 }
  0xf8   :  { %v2119_v16 = vpop.f32.mrf.mxu0  ;;  %v2127_v21 = vpop.f32.mrf.mxu1  ;;  %1816 = vset.pattern.permute.xlu1 %v1931_v24 }
  0xf9   :  { %3077 = vst [vmem:[#allocation9_spill] sm:$0xff] %v2119_v16  ;;  %530 = vadd.xlane.f32.xlu1 %v529_v11  ;;  %527 = vadd.xlane.f32.xlu0 %v526_v12  ;;  %v673_v17 = vadd.f32 %v609_v14, %v608_v8  ;;  %v721_v25 = vadd.f32 %v641_v19, %v640_v18 }
  0xfa   :  { %v2125_v20 = vpop.f32.mrf.mxu0  ;;  %v2135_v27 = vpop.f32.mrf.mxu1  ;;  %v610_v33 = vmul.f32 %v2119_v16, %v2119_v16  ;;  %v642_v45 = vmul.f32 %v2127_v21, %v2127_v21 }
  0xfb   :  { %3078 = vst [vmem:[#allocation10_spill] sm:$0xff] %v2125_v20  ;;  %3080 = vst [vmem:[#allocation12_spill] sm:$0xff] %v2135_v27  ;;  %v484_v29 = vadd.f32 %v2125_v20, %v2119_v16  ;;  %v611_v34 = vmul.f32 %v2125_v20, %v2125_v20  ;;  %v532_v35 = vadd.f32 %v2135_v27, %v2127_v21  ;;  %v2730_v20 = vld [vmem:[%s3020_s2 + $0xe0] sm:$0xff] }
  0xfc   :  { %v2133_v26 = vpop.f32.mrf.mxu0  ;;  %v2141_v31 = vpop.f32.mrf.mxu1  ;;  %v643_v46 = vmul.f32 %v2135_v27, %v2135_v27 }
  0xfd   :  { %671 = vadd.xlane.f32.xlu0 %v670_v22  ;;  %674 = vadd.xlane.f32.xlu1 %v673_v17  ;;  %3079 = vst [vmem:[#allocation11_spill] sm:$0xff] %v2133_v26  ;;  %3082 = vst [vmem:[#allocation14_spill] sm:$0xff] %v2141_v31  ;;  %v676_v39 = vadd.f32 %v611_v34, %v610_v33  ;;  %v612_v41 = vmul.f32 %v2133_v26, %v2133_v26 }
  0xfe   :  { %v2139_v30 = vpop.f32.mrf.mxu0  ;;  %v2153_v37 = vpop.f32.mrf.mxu1  ;;  %v644_v48 = vmul.f32 %v2141_v31, %v2141_v31  ;;  %v724_v52 = vadd.f32 %v643_v46, %v642_v45 }
  0xff   :  { %3081 = vst [vmem:[#allocation13_spill] sm:$0xff] %v2139_v30  ;;  %v487_v36 = vadd.f32 %v2139_v30, %v2133_v26  ;;  %3083 = vst [vmem:[#allocation15_spill] sm:$0xff] %v2153_v37  ;;  %v535_v40 = vadd.f32 %v2153_v37, %v2141_v31  ;;  %v613_v42 = vmul.f32 %v2139_v30, %v2139_v30 }
 0x100   :  { %v2155_v38 = vpop.f32.mrf.mxu0  ;;  %v2165_v44 = vpop.f32.mrf.mxu1  ;;  %v645_v49 = vmul.f32 %v2153_v37, %v2153_v37 }
 0x101   :  { %719 = vadd.xlane.f32.xlu0 %v718_v28  ;;  %722 = vadd.xlane.f32.xlu1 %v721_v25  ;;  %3084 = vst [vmem:[#allocation16_spill] sm:$0xff] %v2155_v38  ;;  %3086 = vst [vmem:[#allocation18_spill] sm:$0xff] %v2165_v44  ;;  %v679_v47 = vadd.f32 %v613_v42, %v612_v41  ;;  %v614_v57 = vmul.f32 %v2155_v38, %v2155_v38 }
 0x102   :  { %v2163_v43 = vpop.f32.mrf.mxu0  ;;  %v2177_v51 = vpop.f32.mrf.mxu1  ;;  %v727_v53 = vadd.f32 %v645_v49, %v644_v48  ;;  %v646_v1 = vmul.f32 %v2165_v44, %v2165_v44 }
 0x103   :  { %3085 = vst [vmem:[#allocation17_spill] sm:$0xff] %v2163_v43  ;;  %3088 = vst [vmem:[#allocation20_spill] sm:$0xff] %v2177_v51  ;;  %v490_v54 = vadd.f32 %v2163_v43, %v2155_v38  ;;  %v615_v58 = vmul.f32 %v2163_v43, %v2163_v43  ;;  %v538_v59 = vadd.f32 %v2177_v51, %v2165_v44 }
 0x104   :  { %v2175_v50 = vpop.f32.mrf.mxu0  ;;  %v2183_v56 = vpop.f32.mrf.mxu1  ;;  %v647_v6 = vmul.f32 %v2177_v51, %v2177_v51  ;;  %v2634_v51 = vld [vmem:[%s3020_s2 + $0xc0] sm:$0xff] }
 0x105   :  { %482 = vadd.xlane.f32.xlu0 %v481_v32  ;;  %485 = vadd.xlane.f32.xlu1 %v484_v29  ;;  %3087 = vst [vmem:[#allocation19_spill] sm:$0xff] %v2175_v50  ;;  %3090 = vst [vmem:[#allocation22_spill] sm:$0xff] %v2183_v56  ;;  %v682_v63 = vadd.f32 %v615_v58, %v614_v57  ;;  %v616_v11 = vmul.f32 %v2175_v50, %v2175_v50 }
 0x106   :  { %v2181_v55 = vpop.f32.mrf.mxu0  ;;  %v2193_v61 = vpop.f32.mrf.mxu1  ;;  %v730_v15 = vadd.f32 %v647_v6, %v646_v1  ;;  %v648_v18 = vmul.f32 %v2183_v56, %v2183_v56 }
 0x107   :  { %3089 = vst [vmem:[#allocation21_spill] sm:$0xff] %v2181_v55  ;;  %v493_v60 = vadd.f32 %v2181_v55, %v2175_v50  ;;  %3091 = vst [vmem:[#allocation23_spill] sm:$0xff] %v2193_v61  ;;  %v541_v8 = vadd.f32 %v2193_v61, %v2183_v56  ;;  %v617_v12 = vmul.f32 %v2181_v55, %v2181_v55 }
 0x108   :  { %v2195_v62 = vpop.f32.mrf.mxu0  ;;  %v2209_v14 = vpop.f32.mrf.mxu1  ;;  %v649_v19 = vmul.f32 %v2193_v61, %v2193_v61 }
 0x109   :  { %533 = vadd.xlane.f32.xlu0 %v532_v35  ;;  %488 = vadd.xlane.f32.xlu1 %v487_v36  ;;  %3092 = vst [vmem:[#allocation24_spill] sm:$0xff] %v2195_v62  ;;  %3094 = vst [vmem:[#allocation26_spill] sm:$0xff] %v2209_v14  ;;  %v685_v17 = vadd.f32 %v617_v12, %v616_v11  ;;  %v618_v33 = vmul.f32 %v2195_v62, %v2195_v62 }
 0x10a   :  { %v2207_v13 = vpop.f32.mrf.mxu0  ;;  %v2217_v23 = vpop.f32.mrf.mxu1  ;;  %v733_v25 = vadd.f32 %v649_v19, %v648_v18  ;;  %v650_v42 = vmul.f32 %v2209_v14, %v2209_v14 }
 0x10b   :  { %3093 = vst [vmem:[#allocation25_spill] sm:$0xff] %v2207_v13  ;;  %3096 = vst [vmem:[#allocation28_spill] sm:$0xff] %v2217_v23  ;;  %v496_v28 = vadd.f32 %v2207_v13, %v2195_v62  ;;  %v619_v34 = vmul.f32 %v2207_v13, %v2207_v13  ;;  %v544_v35 = vadd.f32 %v2217_v23, %v2209_v14 }
 0x10c   :  { %v2215_v22 = vpop.f32.mrf.mxu0  ;;  %v2223_v32 = vpop.f32.mrf.mxu1  ;;  %v651_v45 = vmul.f32 %v2217_v23, %v2217_v23 }
 0x10d   :  { %677 = vadd.xlane.f32.xlu0 %v676_v39  ;;  %536 = vadd.xlane.f32.xlu1 %v535_v40  ;;  %3095 = vst [vmem:[#allocation27_spill] sm:$0xff] %v2215_v22  ;;  %3098 = vst [vmem:[#allocation30_spill] sm:$0xff] %v2223_v32  ;;  %v688_v41 = vadd.f32 %v619_v34, %v618_v33  ;;  %v652_v57 = vmul.f32 %v2223_v32, %v2223_v32 }
 0x10e   :  { %v2221_v29 = vpop.f32.mrf.mxu0  ;;  %v2233_v39 = vpop.f32.mrf.mxu1 }
 0x10f   :  { %3097 = vst [vmem:[#allocation29_spill] sm:$0xff] %v2221_v29  ;;  %v499_v36 = vadd.f32 %v2221_v29, %v2215_v22  ;;  %3099 = vst [vmem:[#allocation31_spill] sm:$0xff] %v2233_v39  ;;  %v547_v46 = vadd.f32 %v2233_v39, %v2223_v32  ;;  %v621_v48 = vmul.f32 %v2221_v29, %v2221_v29 }
 0x110   :  { %v2235_v40 = vpop.f32.mrf.mxu0  ;;  %v653_v58 = vmul.f32 %v2233_v39, %v2233_v39 }
 0x111   :  { %725 = vadd.xlane.f32.xlu0 %v724_v52  ;;  %680 = vadd.xlane.f32.xlu1 %v679_v47  ;;  %3100 = vst [vmem:[#allocation32_spill] sm:$0xff] %v2235_v40  ;;  %v620_v47 = vmul.f32 %v2215_v22, %v2215_v22  ;;  %v2249_v52 = vpop.f32.mrf.mxu1  ;;  %v622_v11 = vmul.f32 %v2235_v40, %v2235_v40 }
 0x112   :  { %v2247_v49 = vpop.f32.mrf.mxu0  ;;  %3102 = vst [vmem:[#allocation34_spill] sm:$0xff] %v2249_v52 }
 0x113   :  { %3101 = vst [vmem:[#allocation33_spill] sm:$0xff] %v2247_v49  ;;  %v502_v1 = vadd.f32 %v2247_v49, %v2235_v40  ;;  %v623_v12 = vmul.f32 %v2247_v49, %v2247_v49 }
 0x115   :  { %728 = vadd.xlane.f32.xlu1 %v727_v53  ;;  %491 = vadd.xlane.f32.xlu0 %v490_v54  ;;  %v736_v53 = vadd.f32 %v651_v45, %v650_v42  ;;  %v691_v54 = vadd.f32 %v621_v48, %v620_v47  ;;  %v694_v24 = vadd.f32 %v623_v12, %v622_v11 }
 0x119   :  { %539 = vadd.xlane.f32.xlu0 %v538_v59  ;;  %494 = vadd.xlane.f32.xlu1 %v493_v60  ;;  %v2255_v59 = vpop.f32.mrf.mxu0  ;;  %v2257_v60 = vpop.f32.mrf.mxu1 }
 0x11a   :  { %3103 = vst [vmem:[#allocation35_spill] sm:$0xff] %v2255_v59  ;;  %3104 = vst [vmem:[#allocation36_spill] sm:$0xff] %v2257_v60  ;;  %v624_v34 = vmul.f32 %v2255_v59, %v2255_v59 }
 0x11b   :  { %v2261_v6 = vpop.f32.mrf.mxu0 }
 0x11c   :  { %3105 = vst [vmem:[#allocation37_spill] sm:$0xff] %v2261_v6 }
 0x11d   :  { %683 = vadd.xlane.f32.xlu0 %v682_v63  ;;  %542 = vadd.xlane.f32.xlu1 %v541_v8  ;;  %v739_v63 = vadd.f32 %v653_v58, %v652_v57  ;;  %v2263_v8 = vpop.f32.mrf.mxu1  ;;  %v2275_v19 = vpop.f32.mrf.mxu0 }
 0x11e   :  { %3106 = vst [vmem:[#allocation38_spill] sm:$0xff] %v2263_v8  ;;  %3108 = vst [vmem:[#allocation40_spill] sm:$0xff] %v2275_v19 }
 0x11f   :  { %v2273_v18 = vpop.f32.mrf.mxu1 }
 0x120   :  { %3107 = vst [vmem:[#allocation39_spill] sm:$0xff] %v2273_v18  ;;  %v553_v33 = vadd.f32 %v2273_v18, %v2263_v8  ;;  %v657_v47 = vmul.f32 %v2273_v18, %v2273_v18 }
 0x121   :  { %731 = vadd.xlane.f32.xlu0 %v730_v15  ;;  %686 = vadd.xlane.f32.xlu1 %v685_v17  ;;  %v550_v15 = vadd.f32 %v2257_v60, %v2249_v52  ;;  %v505_v17 = vadd.f32 %v2261_v6, %v2255_v59 }
 0x125   :  { %734 = vadd.xlane.f32.xlu1 %v733_v25  ;;  %497 = vadd.xlane.f32.xlu0 %v496_v28  ;;  %v654_v25 = vmul.f32 %v2249_v52, %v2249_v52  ;;  %v655_v28 = vmul.f32 %v2257_v60, %v2257_v60 }
 0x127   :  { %v742_v42 = vadd.f32 %v655_v28, %v654_v25 }
 0x129   :  { %545 = vadd.xlane.f32.xlu0 %v544_v35  ;;  %500 = vadd.xlane.f32.xlu1 %v499_v36  ;;  %v625_v35 = vmul.f32 %v2261_v6, %v2261_v6  ;;  %v2287_v36 = vpop.f32.mrf.mxu0 }
 0x12a   :  { %3109 = vst [vmem:[#allocation41_spill] sm:$0xff] %v2287_v36  ;;  %v508_v57 = vadd.f32 %v2287_v36, %v2275_v19  ;;  %v627_v11 = vmul.f32 %v2287_v36, %v2287_v36 }
 0x12b   :  { %v697_v45 = vadd.f32 %v625_v35, %v624_v34  ;;  %v2295_v48 = vpop.f32.mrf.mxu0 }
 0x12c   :  { %3111 = vst [vmem:[#allocation43_spill] sm:$0xff] %v2295_v48  ;;  %v628_v35 = vmul.f32 %v2295_v48, %v2295_v48 }
 0x12d   :  { %689 = vadd.xlane.f32.xlu0 %v688_v41  ;;  %548 = vadd.xlane.f32.xlu1 %v547_v46  ;;  %v2289_v41 = vpop.f32.mrf.mxu1  ;;  %v656_v46 = vmul.f32 %v2263_v8, %v2263_v8  ;;  %v2301_v58 = vpop.f32.mrf.mxu0 }
 0x12e   :  { %3110 = vst [vmem:[#allocation42_spill] sm:$0xff] %v2289_v41  ;;  %3113 = vst [vmem:[#allocation45_spill] sm:$0xff] %v2301_v58  ;;  %v658_v28 = vmul.f32 %v2289_v41, %v2289_v41 }
 0x131   :  { %737 = vadd.xlane.f32.xlu0 %v736_v53  ;;  %692 = vadd.xlane.f32.xlu1 %v691_v54  ;;  %v2297_v53 = vpop.f32.mrf.mxu1  ;;  %v745_v54 = vadd.f32 %v657_v47, %v656_v46 }
 0x132   :  { %3112 = vst [vmem:[#allocation44_spill] sm:$0xff] %v2297_v53  ;;  %v556_v12 = vadd.f32 %v2297_v53, %v2289_v41 }
 0x135   :  { %740 = vadd.xlane.f32.xlu1 %v739_v63  ;;  %503 = vadd.xlane.f32.xlu0 %v502_v1  ;;  %v2303_v63 = vpop.f32.mrf.mxu1  ;;  %v626_v1 = vmul.f32 %v2275_v19, %v2275_v19 }
 0x136   :  { %3114 = vst [vmem:[#allocation46_spill] sm:$0xff] %v2303_v63 }
 0x137   :  { %v700_v25 = vadd.f32 %v627_v11, %v626_v1 }
 0x139   :  { %551 = vadd.xlane.f32.xlu0 %v550_v15  ;;  %506 = vadd.xlane.f32.xlu1 %v505_v17  ;;  %v511_v15 = vadd.f32 %v2301_v58, %v2295_v48  ;;  %v2313_v17 = vpop.f32.mrf.mxu1 }
 0x13a   :  { %3115 = vst [vmem:[#allocation47_spill] sm:$0xff] %v2313_v17  ;;  %v559_v34 = vadd.f32 %v2313_v17, %v2303_v63  ;;  %v661_v1 = vmul.f32 %v2313_v17, %v2313_v17 }
 0x13b   :  { %v2329_v46 = vpop.f32.mrf.mxu1 }
 0x13c   :  { %3118 = vst [vmem:[#allocation50_spill] sm:$0xff] %v2329_v46 }
 0x13d   :  { %695 = vadd.xlane.f32.xlu0 %v694_v24  ;;  %554 = vadd.xlane.f32.xlu1 %v553_v33  ;;  %v2315_v24 = vpop.f32.mrf.mxu0  ;;  %v659_v33 = vmul.f32 %v2297_v53, %v2297_v53 }
 0x13e   :  { %3116 = vst [vmem:[#allocation48_spill] sm:$0xff] %v2315_v24 }
 0x13f   :  { %v748_v47 = vadd.f32 %v659_v33, %v658_v28  ;;  %v630_v33 = vmul.f32 %v2315_v24, %v2315_v24 }
 0x141   :  { %743 = vadd.xlane.f32.xlu0 %v742_v42  ;;  %698 = vadd.xlane.f32.xlu1 %v697_v45  ;;  %v629_v42 = vmul.f32 %v2301_v58, %v2301_v58  ;;  %v2327_v45 = vpop.f32.mrf.mxu0 }
 0x142   :  { %3117 = vst [vmem:[#allocation49_spill] sm:$0xff] %v2327_v45  ;;  %v514_v58 = vadd.f32 %v2327_v45, %v2315_v24 }
 0x143   :  { %v2335_v11 = vpop.f32.mrf.mxu0 }
 0x144   :  { %3119 = vst [vmem:[#allocation51_spill] sm:$0xff] %v2335_v11 }
 0x145   :  { %746 = vadd.xlane.f32.xlu1 %v745_v54  ;;  %509 = vadd.xlane.f32.xlu0 %v508_v57  ;;  %v703_v54 = vadd.f32 %v629_v42, %v628_v35  ;;  %v660_v57 = vmul.f32 %v2303_v63, %v2303_v63  ;;  %v2341_v28 = vpop.f32.mrf.mxu0 }
 0x146   :  { %3121 = vst [vmem:[#allocation53_spill] sm:$0xff] %v2341_v28  ;;  %v517_v42 = vadd.f32 %v2341_v28, %v2335_v11  ;;  %v633_v63 = vmul.f32 %v2341_v28, %v2341_v28 }
 0x149   :  { %557 = vadd.xlane.f32.xlu0 %v556_v12  ;;  %512 = vadd.xlane.f32.xlu1 %v511_v15  ;;  %v2337_v12 = vpop.f32.mrf.mxu1  ;;  %v751_v15 = vadd.f32 %v661_v1, %v660_v57  ;;  %v662_v1 = vmul.f32 %v2329_v46, %v2329_v46 }
 0x14a   :  { %3120 = vst [vmem:[#allocation52_spill] sm:$0xff] %v2337_v12  ;;  %v562_v35 = vadd.f32 %v2337_v12, %v2329_v46  ;;  %v663_v17 = vmul.f32 %v2337_v12, %v2337_v12 }
 0x14d   :  { %701 = vadd.xlane.f32.xlu0 %v700_v25  ;;  %560 = vadd.xlane.f32.xlu1 %v559_v34  ;;  %v2343_v25 = vpop.f32.mrf.mxu1  ;;  %v631_v34 = vmul.f32 %v2327_v45, %v2327_v45 }
 0x14e   :  { %3122 = vst [vmem:[#allocation54_spill] sm:$0xff] %v2343_v25 }
 0x14f   :  { %v706_v57 = vadd.f32 %v631_v34, %v630_v33  ;;  %v754_v34 = vadd.f32 %v663_v17, %v662_v1 }
 0x151   :  { %749 = vadd.xlane.f32.xlu0 %v748_v47  ;;  %704 = vadd.xlane.f32.xlu1 %v703_v54  ;;  %v2353_v47 = vpop.f32.mrf.mxu1  ;;  %v2355_v54 = vpop.f32.mrf.mxu0 }
 0x152   :  { %3123 = vst [vmem:[#allocation55_spill] sm:$0xff] %v2353_v47  ;;  %3124 = vst [vmem:[#allocation56_spill] sm:$0xff] %v2355_v54 }
 0x153   :  { %v2367_v45 = vpop.f32.mrf.mxu0  ;;  %v2369_v33 = vpop.f32.mrf.mxu1 }
 0x154   :  { %3125 = vst [vmem:[#allocation57_spill] sm:$0xff] %v2367_v45  ;;  %3126 = vst [vmem:[#allocation58_spill] sm:$0xff] %v2369_v33  ;;  %v520_v24 = vadd.f32 %v2367_v45, %v2355_v54  ;;  %v635_v1 = vmul.f32 %v2367_v45, %v2367_v45 }
 0x155   :  { %752 = vadd.xlane.f32.xlu1 %v751_v15  ;;  %515 = vadd.xlane.f32.xlu0 %v514_v58  ;;  %v565_v58 = vadd.f32 %v2353_v47, %v2343_v25  ;;  %v632_v15 = vmul.f32 %v2335_v11, %v2335_v11  ;;  %v2375_v12 = vpop.f32.mrf.mxu0  ;;  %v2377_v11 = vpop.f32.mrf.mxu1 }
 0x156   :  { %3127 = vst [vmem:[#allocation59_spill] sm:$0xff] %v2375_v12  ;;  %3128 = vst [vmem:[#allocation60_spill] sm:$0xff] %v2377_v11 }
 0x157   :  { %v709_v46 = vadd.f32 %v633_v63, %v632_v15  ;;  %v2381_v17 = vpop.f32.mrf.mxu0  ;;  %v634_v63 = vmul.f32 %v2355_v54, %v2355_v54 }
 0x158   :  { %3129 = vst [vmem:[#allocation61_spill] sm:$0xff] %v2381_v17 }
 0x159   :  { %563 = vadd.xlane.f32.xlu0 %v562_v35  ;;  %518 = vadd.xlane.f32.xlu1 %v517_v42  ;;  %v664_v35 = vmul.f32 %v2343_v25, %v2343_v25  ;;  %v665_v42 = vmul.f32 %v2353_v47, %v2353_v47  ;;  %v637_v47 = vmul.f32 %v2381_v17, %v2381_v17 }
 0x15b   :  { %v757_v28 = vadd.f32 %v665_v42, %v664_v35  ;;  %v666_v35 = vmul.f32 %v2369_v33, %v2369_v33  ;;  %v667_v42 = vmul.f32 %v2377_v11, %v2377_v11 }
 0x15d   :  { %707 = vadd.xlane.f32.xlu0 %v706_v57  ;;  %566 = vadd.xlane.f32.xlu1 %v565_v58  ;;  %v2383_v57 = vpop.f32.mrf.mxu1  ;;  %v568_v58 = vadd.f32 %v2377_v11, %v2369_v33  ;;  %v760_v25 = vadd.f32 %v667_v42, %v666_v35 }
 0x15e   :  { %3130 = vst [vmem:[#allocation62_spill] sm:$0xff] %v2383_v57  ;;  %v668_v11 = vmul.f32 %v2383_v57, %v2383_v57 }
 0x15f   :  { %v2393_v15 = vpop.f32.mrf.mxu1 }
 0x160   :  { %3131 = vst [vmem:[#allocation63_spill] sm:$0xff] %v2393_v15 }
 0x161   :  { %755 = vadd.xlane.f32.xlu0 %v754_v34  ;;  %710 = vadd.xlane.f32.xlu1 %v709_v46  ;;  %v523_v46 = vadd.f32 %v2381_v17, %v2375_v12  ;;  %v712_v34 = vadd.f32 %v635_v1, %v634_v63  ;;  %v669_v63 = vmul.f32 %v2393_v15, %v2393_v15 }
 0x165   :  { %758 = vadd.xlane.f32.xlu1 %v757_v28  ;;  %521 = vadd.xlane.f32.xlu0 %v520_v24  ;;  %v571_v24 = vadd.f32 %v2393_v15, %v2383_v57  ;;  %v636_v28 = vmul.f32 %v2375_v12, %v2375_v12 }
 0x167   :  { %v715_v1 = vadd.f32 %v637_v47, %v636_v28 }
 0x169   :  { %569 = vadd.xlane.f32.xlu0 %v568_v58  ;;  %524 = vadd.xlane.f32.xlu1 %v523_v46  ;;  %v763_v58 = vadd.f32 %v669_v63, %v668_v11 }
 0x16d   :  { %713 = vadd.xlane.f32.xlu0 %v712_v34  ;;  %572 = vadd.xlane.f32.xlu1 %v571_v24 }
 0x171   :  { %761 = vadd.xlane.f32.xlu0 %v760_v25  ;;  %716 = vadd.xlane.f32.xlu1 %v715_v1 }
 0x175   :  { %764 = vadd.xlane.f32.xlu1 %v763_v58 }
 0x17e   :  { %v480_v46 = vpop.xlane.xlu0 %479 }
 0x17f   :  { %v574_v45 = vmul.f32 0.0051020407, %v480_v46 }
 0x181   :  { %v798_v12 = vmul.f32 %v574_v45, %v574_v45 }
 0x182   :  { %v531_v17 = vpop.xlane.xlu1 %530  ;;  %v528_v33 = vpop.xlane.xlu0 %527 }
 0x183   :  { %v2409_v54 = vmul.f32 0.0051020407, %v531_v17  ;;  %v2411_v15 = vmul.f32 0.0051020407, %v528_v33 }
 0x185   :  { %v815_v24 = vmul.f32 %v2409_v54, %v2409_v54  ;;  %v814_v11 = vmul.f32 %v2411_v15, %v2411_v15 }
 0x186   :  { %v672_v35 = vpop.xlane.xlu0 %671  ;;  %v675_v42 = vpop.xlane.xlu1 %674 }
 0x187   :  { %v766_v34 = vmul.f32 0.0051020407, %v672_v35 }
 0x189   :  { %v830_v47 = vsub.f32 %v766_v34, %v798_v12  ;;  %v767_v12 = vmul.f32 0.0051020407, %v675_v42 }
 0x18a   :  { %v720_v25 = vpop.xlane.xlu0 %719  ;;  %v723_v28 = vpop.xlane.xlu1 %722 }
 0x18b   :  { %v862_v63 = vadd.f32 1e-05, %v830_v47  ;;  %v782_v1 = vmul.f32 0.0051020407, %v720_v25  ;;  %v783_v58 = vmul.f32 0.0051020407, %v723_v28 }
 0x18d   :  { %1819 = vrsqrt.f32 %v862_v63  ;;  %v846_v17 = vsub.f32 %v782_v1, %v814_v11  ;;  %v847_v46 = vsub.f32 %v783_v58, %v815_v24 }
 0x18e   :  { %v483_v57 = vpop.xlane.xlu0 %482  ;;  %v486_v48 = vpop.xlane.xlu1 %485 }
 0x18f   :  { %v878_v33 = vadd.f32 1e-05, %v846_v17  ;;  %v2417_v53 = vmul.f32 0.0051020407, %v483_v57  ;;  %v2421_v34 = vmul.f32 0.0051020407, %v486_v48 }
 0x190   :  { %v879_v41 = vadd.f32 1e-05, %v847_v46  ;;  %v2432_v48 = vld [vmem:[%s3020_s2] sm:$0xff] }
 0x191   :  { %1821 = vrsqrt.f32 %v878_v33  ;;  %v799_v35 = vmul.f32 %v2417_v53, %v2417_v53  ;;  %v800_v24 = vmul.f32 %v2421_v34, %v2421_v34 }
 0x192   :  { %v534_v18 = vpop.xlane.xlu0 %533  ;;  %v489_v47 = vpop.xlane.xlu1 %488  ;;  %1823 = vrsqrt.f32 %v879_v41 }
 0x193   :  { %v831_v25 = vsub.f32 %v767_v12, %v799_v35  ;;  %v2425_v11 = vmul.f32 0.0051020407, %v489_v47  ;;  %v2427_v42 = vmul.f32 0.0051020407, %v534_v18 }
 0x195   :  { %v863_v28 = vadd.f32 1e-05, %v831_v25  ;;  %v801_v58 = vmul.f32 %v2425_v11, %v2425_v11  ;;  %v816_v35 = vmul.f32 %v2427_v42, %v2427_v42 }
 0x196   :  { %v678_v57 = vpop.xlane.xlu0 %677  ;;  %v537_v63 = vpop.xlane.xlu1 %536 }
 0x197   :  { %1825 = vrsqrt.f32 %v863_v28  ;;  %v768_v1 = vmul.f32 0.0051020407, %v678_v57  ;;  %v2436_v46 = vmul.f32 0.0051020407, %v537_v63  ;;  %v2444_v57 = vld [vmem:[%s3020_s2 + $0x80] sm:$0xff] }
 0x199   :  { %v832_v17 = vsub.f32 %v768_v1, %v800_v24  ;;  %v817_v24 = vmul.f32 %v2436_v46, %v2436_v46 }
 0x19a   :  { %v1820_v33 = vpop.eup %1819  ;;  %v726_v12 = vpop.xlane.xlu0 %725 }
 0x19b   :  { %v681_v41 = vpop.xlane.xlu1 %680  ;;  %v784_v18 = vmul.f32 0.0051020407, %v726_v12  ;;  %v958_v25 = vmul.f32 %v1820_v33, %v2432_v48  ;;  %v864_v28 = vadd.f32 1e-05, %v832_v17 }
 0x19c   :  { %v769_v47 = vmul.f32 0.0051020407, %v681_v41 }
 0x19d   :  { %v848_v63 = vsub.f32 %v784_v18, %v816_v35  ;;  %1184 = vperm.xlu0 %1815, %v958_v25   ;;  %v990_v41 = vmul.f32 %v958_v25, %v574_v45  ;;  %1827 = vrsqrt.f32 %v864_v28 }
 0x19e   :  { %v833_v1 = vsub.f32 %v769_v47, %v801_v58  ;;  %v1822_v8 = vpop.eup %1821  ;;  %v492_v19 = vpop.xlane.xlu0 %491  ;;  %v2455_v58 = vld [vmem:[%s3020_s2 + $0x8] sm:$0xff] }
 0x19f   :  { %v729_v36 = vpop.xlane.xlu1 %728  ;;  %v880_v6 = vadd.f32 1e-05, %v848_v63  ;;  %v974_v33 = vmul.f32 %v1822_v8, %v2444_v57  ;;  %v2449_v60 = vmul.f32 0.0051020407, %v492_v19  ;;  %v1824_v45 = vpop.eup %1823  ;;  %v2463_v19 = vld [vmem:[%s3020_s2 + $0x88] sm:$0xff] }
 0x1a0   :  { %v785_v12 = vmul.f32 0.0051020407, %v729_v36  ;;  %v865_v17 = vadd.f32 1e-05, %v833_v1 }
 0x1a1   :  { %1829 = vrsqrt.f32 %v880_v6  ;;  %1054 = vrot.lane.b32.xlu0 %v990_v41, %s1932_s6  ;;  %1264 = vperm.xlu1 %1816, %v974_v33   ;;  %v1006_v8 = vmul.f32 %v974_v33, %v2411_v15  ;;  %v802_v28 = vmul.f32 %v2449_v60, %v2449_v60 }
 0x1a2   :  { %v849_v59 = vsub.f32 %v785_v12, %v817_v24  ;;  %v540_v35 = vpop.xlane.xlu0 %539  ;;  %1831 = vrsqrt.f32 %v865_v17 }
 0x1a3   :  { %v495_v36 = vpop.xlane.xlu1 %494  ;;  %v2458_v47 = vmul.f32 0.0051020407, %v540_v35 }
 0x1a4   :  { %v1826_v18 = vpop.eup %1825  ;;  %v881_v6 = vadd.f32 1e-05, %v849_v59  ;;  %v2468_v24 = vmul.f32 0.0051020407, %v495_v36  ;;  %v975_v59 = vmul.f32 %v1824_v45, %v2463_v19 }
 0x1a5   :  { %v959_v25 = vmul.f32 %v1826_v18, %v2455_v58  ;;  %1086 = vrot.lane.b32.xlu0 %v1006_v8, %s1932_s6  ;;  %v818_v12 = vmul.f32 %v2458_v47, %v2458_v47 }
 0x1a6   :  { %v684_v15 = vpop.xlane.xlu0 %683  ;;  %1833 = vrsqrt.f32 %v881_v6  ;;  %v803_v33 = vmul.f32 %v2468_v24, %v2468_v24  ;;  %v1007_v45 = vmul.f32 %v975_v59, %v2409_v54 }
 0x1a7   :  { %v543_v63 = vpop.xlane.xlu1 %542  ;;  %v770_v1 = vmul.f32 0.0051020407, %v684_v15  ;;  %1189 = vperm.xlu1 %1816, %v959_v25   ;;  %v991_v41 = vmul.f32 %v959_v25, %v2417_v53  ;;  %v2484_v53 = vld [vmem:[%s3020_s2 + $0x90] sm:$0xff] }
 0x1a8   :  { %v2477_v35 = vmul.f32 0.0051020407, %v543_v63 }
 0x1a9   :  { %v834_v17 = vsub.f32 %v770_v1, %v802_v28  ;;  %1269 = vperm.xlu0 %1815, %v975_v59   ;;  %v2491_v1 = vld [vmem:[%s3020_s2 + $0x10] sm:$0xff] }
 0x1aa   :  { %v732_v36 = vpop.xlane.xlu0 %731  ;;  %v1828_v6 = vpop.eup %1827  ;;  %v819_v25 = vmul.f32 %v2477_v35, %v2477_v35 }
 0x1ab   :  { %v687_v8 = vpop.xlane.xlu1 %686  ;;  %v866_v18 = vadd.f32 1e-05, %v834_v17  ;;  %v786_v15 = vmul.f32 0.0051020407, %v732_v36  ;;  %1056 = vrot.lane.b32.xlu1 %v991_v41, %s1932_s6  ;;  %v960_v39 = vmul.f32 %v1828_v6, %v2491_v1  ;;  %v2509_v6 = vld [vmem:[%s3020_s2 + $0x98] sm:$0xff] }
 0x1ac   :  { %v771_v52 = vmul.f32 0.0051020407, %v687_v8 }
 0x1ad   :  { %1835 = vrsqrt.f32 %v866_v18  ;;  %v850_v28 = vsub.f32 %v786_v15, %v818_v12  ;;  %v2502_v15 = vld [vmem:[%s3020_s2 + $0x18] sm:$0xff]  ;;  %v992_v49 = vmul.f32 %v960_v39, %v2421_v34 }
 0x1ae   :  { %v835_v63 = vsub.f32 %v771_v52, %v803_v33  ;;  %v1830_v41 = vpop.eup %1829  ;;  %v498_v54 = vpop.xlane.xlu0 %497 }
 0x1af   :  { %v735_v17 = vpop.xlane.xlu1 %734  ;;  %v882_v59 = vadd.f32 1e-05, %v850_v28  ;;  %1088 = vrot.lane.b32.xlu1 %v1007_v45, %s1932_s6  ;;  %v976_v8 = vmul.f32 %v1830_v41, %v2484_v53  ;;  %v1832_v32 = vpop.eup %1831  ;;  %v2496_v12 = vmul.f32 0.0051020407, %v498_v54 }
 0x1b0   :  { %v787_v36 = vmul.f32 0.0051020407, %v735_v17  ;;  %v867_v18 = vadd.f32 1e-05, %v835_v63  ;;  %v961_v45 = vmul.f32 %v1832_v32, %v2502_v15 }
 0x1b1   :  { %1837 = vrsqrt.f32 %v882_v59  ;;  %v1008_v33 = vmul.f32 %v976_v8, %v2427_v42  ;;  %v804_v63 = vmul.f32 %v2496_v12, %v2496_v12 }
 0x1b2   :  { %v851_v52 = vsub.f32 %v787_v36, %v819_v25  ;;  %v546_v28 = vpop.xlane.xlu0 %545  ;;  %1839 = vrsqrt.f32 %v867_v18 }
 0x1b3   :  { %v501_v17 = vpop.xlane.xlu1 %500  ;;  %1090 = vrot.lane.b32.xlu0 %v1008_v33, %s1932_s6  ;;  %1194 = vperm.xlu1 %1816, %v960_v39   ;;  %v1834_v25 = vpop.eup %1833  ;;  %v2513_v41 = vmul.f32 0.0051020407, %v546_v28 }
 0x1b4   :  { %v883_v42 = vadd.f32 1e-05, %v851_v52  ;;  %v2515_v54 = vmul.f32 0.0051020407, %v501_v17  ;;  %v977_v18 = vmul.f32 %v1834_v25, %v2509_v6  ;;  %v2524_v52 = vld [vmem:[%s3020_s2 + $0x20] sm:$0xff] }
 0x1b5   :  { %v820_v28 = vmul.f32 %v2513_v41, %v2513_v41 }
 0x1b6   :  { %v690_v59 = vpop.xlane.xlu0 %689  ;;  %1841 = vrsqrt.f32 %v883_v42  ;;  %v805_v17 = vmul.f32 %v2515_v54, %v2515_v54  ;;  %v993_v42 = vmul.f32 %v961_v45, %v2425_v11  ;;  %v1009_v61 = vmul.f32 %v977_v18, %v2436_v46 }
 0x1b7   :  { %v549_v36 = vpop.xlane.xlu1 %548  ;;  %v772_v33 = vmul.f32 0.0051020407, %v690_v59  ;;  %1199 = vperm.xlu0 %1815, %v961_v45   ;;  %1274 = vperm.xlu1 %1816, %v976_v8  }
 0x1b8   :  { %v2517_v32 = vmul.f32 0.0051020407, %v549_v36 }
 0x1b9   :  { %v836_v59 = vsub.f32 %v772_v33, %v804_v63  ;;  %v2538_v63 = vld [vmem:[%s3020_s2 + $0xa0] sm:$0xff] }
 0x1ba   :  { %v1836_v8 = vpop.eup %1835  ;;  %v738_v36 = vpop.xlane.xlu0 %737  ;;  %v821_v34 = vmul.f32 %v2517_v32, %v2517_v32 }
 0x1bb   :  { %v693_v40 = vpop.xlane.xlu1 %692  ;;  %v868_v29 = vadd.f32 1e-05, %v836_v59  ;;  %v788_v25 = vmul.f32 0.0051020407, %v738_v36  ;;  %1279 = vperm.xlu0 %1815, %v977_v18   ;;  %1058 = vrot.lane.b32.xlu1 %v992_v49, %s1932_s6  ;;  %v962_v39 = vmul.f32 %v1836_v8, %v2524_v52 }
 0x1bc   :  { %v773_v22 = vmul.f32 0.0051020407, %v693_v40 }
 0x1bd   :  { %1843 = vrsqrt.f32 %v868_v29  ;;  %v852_v33 = vsub.f32 %v788_v25, %v820_v28  ;;  %v994_v40 = vmul.f32 %v962_v39, %v2449_v60 }
 0x1be   :  { %v837_v59 = vsub.f32 %v773_v22, %v805_v17  ;;  %v1838_v36 = vpop.eup %1837  ;;  %v504_v49 = vpop.xlane.xlu0 %503 }
 0x1bf   :  { %v741_v23 = vpop.xlane.xlu1 %740  ;;  %v884_v14 = vadd.f32 1e-05, %v852_v33  ;;  %1062 = vrot.lane.b32.xlu0 %v994_v40, %s1932_s6  ;;  %1060 = vrot.lane.b32.xlu1 %v993_v42, %s1932_s6  ;;  %v978_v11 = vmul.f32 %v1838_v36, %v2538_v63  ;;  %v1840_v56 = vpop.eup %1839  ;;  %v2545_v22 = vmul.f32 0.0051020407, %v504_v49  ;;  %v2572_v36 = vld [vmem:[%s3020_s2 + $0x30] sm:$0xff] }
 0x1c0   :  { %v789_v8 = vmul.f32 0.0051020407, %v741_v23  ;;  %v869_v45 = vadd.f32 1e-05, %v837_v59  ;;  %v2551_v23 = vld [vmem:[%s3020_s2 + $0x28] sm:$0xff] }
 0x1c1   :  { %1845 = vrsqrt.f32 %v884_v14  ;;  %v1010_v60 = vmul.f32 %v978_v11, %v2458_v47  ;;  %v806_v14 = vmul.f32 %v2545_v22, %v2545_v22  ;;  %v963_v47 = vmul.f32 %v1840_v56, %v2551_v23  ;;  %v2565_v59 = vld [vmem:[%s3020_s2 + $0xa8] sm:$0xff] }
 0x1c2   :  { %v853_v29 = vsub.f32 %v789_v8, %v821_v34  ;;  %v552_v28 = vpop.xlane.xlu0 %551  ;;  %1847 = vrsqrt.f32 %v869_v45 }
 0x1c3   :  { %v507_v17 = vpop.xlane.xlu1 %506  ;;  %1094 = vrot.lane.b32.xlu0 %v1010_v60, %s1932_s6  ;;  %1092 = vrot.lane.b32.xlu1 %v1009_v61, %s1932_s6  ;;  %v2557_v18 = vmul.f32 0.0051020407, %v552_v28  ;;  %v1842_v34 = vpop.eup %1841  ;;  %v995_v13 = vmul.f32 %v963_v47, %v2468_v24 }
 0x1c4   :  { %v885_v46 = vadd.f32 1e-05, %v853_v29  ;;  %v2559_v25 = vmul.f32 0.0051020407, %v507_v17  ;;  %v979_v45 = vmul.f32 %v1842_v34, %v2565_v59 }
 0x1c5   :  { %v822_v56 = vmul.f32 %v2557_v18, %v2557_v18 }
 0x1c6   :  { %v696_v42 = vpop.xlane.xlu0 %695  ;;  %1849 = vrsqrt.f32 %v885_v46  ;;  %v807_v49 = vmul.f32 %v2559_v25, %v2559_v25  ;;  %v1011_v55 = vmul.f32 %v979_v45, %v2477_v35 }
 0x1c7   :  { %v555_v33 = vpop.xlane.xlu1 %554  ;;  %v774_v61 = vmul.f32 0.0051020407, %v696_v42  ;;  %1209 = vperm.xlu0 %1815, %v963_v47   ;;  %1204 = vperm.xlu1 %1816, %v962_v39  }
 0x1c8   :  { %v2567_v40 = vmul.f32 0.0051020407, %v555_v33 }
 0x1c9   :  { %v838_v8 = vsub.f32 %v774_v61, %v806_v14  ;;  %v2586_v14 = vld [vmem:[%s3020_s2 + $0xb0] sm:$0xff] }
 0x1ca   :  { %v1844_v29 = vpop.eup %1843  ;;  %v744_v60 = vpop.xlane.xlu0 %743  ;;  %v823_v33 = vmul.f32 %v2567_v40, %v2567_v40 }
 0x1cb   :  { %v699_v39 = vpop.xlane.xlu1 %698  ;;  %v870_v28 = vadd.f32 1e-05, %v838_v8  ;;  %v790_v17 = vmul.f32 0.0051020407, %v744_v60  ;;  %1289 = vperm.xlu0 %1815, %v979_v45   ;;  %1284 = vperm.xlu1 %1816, %v978_v11   ;;  %v964_v42 = vmul.f32 %v1844_v29, %v2572_v36 }
 0x1cc   :  { %v775_v46 = vmul.f32 0.0051020407, %v699_v39 }
 0x1cd   :  { %1851 = vrsqrt.f32 %v870_v28  ;;  %v854_v34 = vsub.f32 %v790_v17, %v822_v56  ;;  %v996_v8 = vmul.f32 %v964_v42, %v2496_v12  ;;  %v2599_v28 = vld [vmem:[%s3020_s2 + $0x38] sm:$0xff] }
 0x1ce   :  { %v839_v61 = vsub.f32 %v775_v46, %v807_v49  ;;  %v1846_v60 = vpop.eup %1845  ;;  %v510_v11 = vpop.xlane.xlu0 %509 }
 0x1cf   :  { %v747_v39 = vpop.xlane.xlu1 %746  ;;  %v886_v62 = vadd.f32 1e-05, %v854_v34  ;;  %1066 = vrot.lane.b32.xlu0 %v996_v8, %s1932_s6  ;;  %1064 = vrot.lane.b32.xlu1 %v995_v13, %s1932_s6  ;;  %v980_v24 = vmul.f32 %v1846_v60, %v2586_v14  ;;  %v1848_v50 = vpop.eup %1847  ;;  %v2593_v49 = vmul.f32 0.0051020407, %v510_v11 }
 0x1d0   :  { %v791_v29 = vmul.f32 0.0051020407, %v747_v39  ;;  %v871_v47 = vadd.f32 1e-05, %v839_v61  ;;  %v965_v13 = vmul.f32 %v1848_v50, %v2599_v28  ;;  %v2621_v39 = vld [vmem:[%s3020_s2 + $0x40] sm:$0xff] }
 0x1d1   :  { %1853 = vrsqrt.f32 %v886_v62  ;;  %v1012_v12 = vmul.f32 %v980_v24, %v2513_v41  ;;  %v2607_v62 = vld [vmem:[%s3020_s2 + $0xb8] sm:$0xff]  ;;  %v808_v45 = vmul.f32 %v2593_v49, %v2593_v49 }
 0x1d2   :  { %v855_v56 = vsub.f32 %v791_v29, %v823_v33  ;;  %v558_v17 = vpop.xlane.xlu0 %557  ;;  %1855 = vrsqrt.f32 %v871_v47 }
 0x1d3   :  { %v513_v46 = vpop.xlane.xlu1 %512  ;;  %1098 = vrot.lane.b32.xlu0 %v1012_v12, %s1932_s6  ;;  %1096 = vrot.lane.b32.xlu1 %v1011_v55, %s1932_s6  ;;  %v1850_v35 = vpop.eup %1849  ;;  %v2611_v33 = vmul.f32 0.0051020407, %v558_v17 }
 0x1d4   :  { %v887_v41 = vadd.f32 1e-05, %v855_v56  ;;  %v2613_v34 = vmul.f32 0.0051020407, %v513_v46  ;;  %v981_v60 = vmul.f32 %v1850_v35, %v2607_v62 }
 0x1d5   :  { %v824_v11 = vmul.f32 %v2611_v33, %v2611_v33 }
 0x1d6   :  { %v702_v61 = vpop.xlane.xlu0 %701  ;;  %1857 = vrsqrt.f32 %v887_v41  ;;  %v809_v29 = vmul.f32 %v2613_v34, %v2613_v34  ;;  %v1013_v37 = vmul.f32 %v981_v60, %v2517_v32 }
 0x1d7   :  { %v561_v8 = vpop.xlane.xlu1 %560  ;;  %v776_v55 = vmul.f32 0.0051020407, %v702_v61  ;;  %1219 = vperm.xlu0 %1815, %v965_v13   ;;  %1214 = vperm.xlu1 %1816, %v964_v42  }
 0x1d8   :  { %v2615_v50 = vmul.f32 0.0051020407, %v561_v8  ;;  %v997_v8 = vmul.f32 %v965_v13, %v2515_v54 }
 0x1d9   :  { %v840_v47 = vsub.f32 %v776_v55, %v808_v45 }
 0x1da   :  { %v1852_v56 = vpop.eup %1851  ;;  %v750_v12 = vpop.xlane.xlu0 %749  ;;  %v825_v41 = vmul.f32 %v2615_v50, %v2615_v50 }
 0x1db   :  { %v705_v42 = vpop.xlane.xlu1 %704  ;;  %v872_v17 = vadd.f32 1e-05, %v840_v47  ;;  %v792_v46 = vmul.f32 0.0051020407, %v750_v12  ;;  %1299 = vperm.xlu0 %1815, %v981_v60   ;;  %1294 = vperm.xlu1 %1816, %v980_v24   ;;  %v966_v35 = vmul.f32 %v1852_v56, %v2621_v39 }
 0x1dc   :  { %v777_v61 = vmul.f32 0.0051020407, %v705_v42 }
 0x1dd   :  { %1859 = vrsqrt.f32 %v872_v17  ;;  %v856_v45 = vsub.f32 %v792_v46, %v824_v11  ;;  %v998_v47 = vmul.f32 %v966_v35, %v2545_v22 }
 0x1de   :  { %v841_v55 = vsub.f32 %v777_v61, %v809_v29  ;;  %v1854_v12 = vpop.eup %1853  ;;  %v516_v24 = vpop.xlane.xlu0 %515  ;;  %v2647_v61 = vld [vmem:[%s3020_s2 + $0x48] sm:$0xff] }
 0x1df   :  { %v753_v42 = vpop.xlane.xlu1 %752  ;;  %v888_v44 = vadd.f32 1e-05, %v856_v45  ;;  %1070 = vrot.lane.b32.xlu0 %v998_v47, %s1932_s6  ;;  %1068 = vrot.lane.b32.xlu1 %v997_v8, %s1932_s6  ;;  %v982_v54 = vmul.f32 %v1854_v12, %v2634_v51  ;;  %v1856_v31 = vpop.eup %1855  ;;  %v2641_v29 = vmul.f32 0.0051020407, %v516_v24  ;;  %v2661_v47 = vld [vmem:[%s3020_s2 + $0xc8] sm:$0xff] }
 0x1e0   :  { %v793_v56 = vmul.f32 0.0051020407, %v753_v42  ;;  %v873_v13 = vadd.f32 1e-05, %v841_v55  ;;  %v2668_v42 = vld [vmem:[%s3020_s2 + $0x50] sm:$0xff] }
 0x1e1   :  { %1861 = vrsqrt.f32 %v888_v44  ;;  %v1014_v22 = vmul.f32 %v982_v54, %v2557_v18  ;;  %v810_v44 = vmul.f32 %v2641_v29, %v2641_v29  ;;  %v967_v18 = vmul.f32 %v1856_v31, %v2647_v61 }
 0x1e2   :  { %v857_v11 = vsub.f32 %v793_v56, %v825_v41  ;;  %v564_v17 = vpop.xlane.xlu0 %563  ;;  %1863 = vrsqrt.f32 %v873_v13 }
 0x1e3   :  { %v519_v46 = vpop.xlane.xlu1 %518  ;;  %1102 = vrot.lane.b32.xlu0 %v1014_v22, %s1932_s6  ;;  %1100 = vrot.lane.b32.xlu1 %v1013_v37, %s1932_s6  ;;  %v2653_v60 = vmul.f32 0.0051020407, %v564_v17  ;;  %v1858_v8 = vpop.eup %1857  ;;  %v999_v43 = vmul.f32 %v967_v18, %v2559_v25 }
 0x1e4   :  { %v889_v32 = vadd.f32 1e-05, %v857_v11  ;;  %v2655_v41 = vmul.f32 0.0051020407, %v519_v46  ;;  %v983_v13 = vmul.f32 %v1858_v8, %v2661_v47 }
 0x1e5   :  { %v826_v31 = vmul.f32 %v2653_v60, %v2653_v60 }
 0x1e6   :  { %v708_v45 = vpop.xlane.xlu0 %707  ;;  %1865 = vrsqrt.f32 %v889_v32  ;;  %v811_v24 = vmul.f32 %v2655_v41, %v2655_v41  ;;  %v1015_v30 = vmul.f32 %v983_v13, %v2567_v40 }
 0x1e7   :  { %v567_v55 = vpop.xlane.xlu1 %566  ;;  %v778_v37 = vmul.f32 0.0051020407, %v708_v45  ;;  %1229 = vperm.xlu0 %1815, %v967_v18   ;;  %1224 = vperm.xlu1 %1816, %v966_v35  }
 0x1e8   :  { %v2663_v12 = vmul.f32 0.0051020407, %v567_v55 }
 0x1e9   :  { %v842_v56 = vsub.f32 %v778_v37, %v810_v44  ;;  %v2682_v44 = vld [vmem:[%s3020_s2 + $0xd0] sm:$0xff] }
 0x1ea   :  { %v1860_v11 = vpop.eup %1859  ;;  %v756_v22 = vpop.xlane.xlu0 %755  ;;  %v827_v55 = vmul.f32 %v2663_v12, %v2663_v12 }
 0x1eb   :  { %v711_v35 = vpop.xlane.xlu1 %710  ;;  %v874_v17 = vadd.f32 1e-05, %v842_v56  ;;  %v794_v46 = vmul.f32 0.0051020407, %v756_v22  ;;  %1309 = vperm.xlu0 %1815, %v983_v13   ;;  %1304 = vperm.xlu1 %1816, %v982_v54   ;;  %v968_v45 = vmul.f32 %v1860_v11, %v2668_v42 }
 0x1ec   :  { %v779_v32 = vmul.f32 0.0051020407, %v711_v35 }
 0x1ed   :  { %1867 = vrsqrt.f32 %v874_v17  ;;  %v858_v8 = vsub.f32 %v794_v46, %v826_v31  ;;  %v1000_v56 = vmul.f32 %v968_v45, %v2593_v49  ;;  %v2695_v17 = vld [vmem:[%s3020_s2 + $0x58] sm:$0xff] }
 0x1ee   :  { %v843_v37 = vsub.f32 %v779_v32, %v811_v24  ;;  %v1862_v22 = vpop.eup %1861  ;;  %v522_v54 = vpop.xlane.xlu0 %521 }
 0x1ef   :  { %v759_v35 = vpop.xlane.xlu1 %758  ;;  %v890_v38 = vadd.f32 1e-05, %v858_v8  ;;  %1074 = vrot.lane.b32.xlu0 %v1000_v56, %s1932_s6  ;;  %1072 = vrot.lane.b32.xlu1 %v999_v43, %s1932_s6  ;;  %v984_v25 = vmul.f32 %v1862_v22, %v2682_v44  ;;  %v1864_v26 = vpop.eup %1863  ;;  %v2689_v24 = vmul.f32 0.0051020407, %v522_v54 }
 0x1f0   :  { %v795_v11 = vmul.f32 0.0051020407, %v759_v35  ;;  %v875_v18 = vadd.f32 1e-05, %v843_v37  ;;  %v969_v43 = vmul.f32 %v1864_v26, %v2695_v17  ;;  %v2717_v35 = vld [vmem:[%s3020_s2 + $0x60] sm:$0xff] }
 0x1f1   :  { %1869 = vrsqrt.f32 %v890_v38  ;;  %v1016_v49 = vmul.f32 %v984_v25, %v2611_v33  ;;  %v2703_v38 = vld [vmem:[%s3020_s2 + $0xd8] sm:$0xff]  ;;  %v812_v13 = vmul.f32 %v2689_v24, %v2689_v24 }
 0x1f2   :  { %v859_v31 = vsub.f32 %v795_v11, %v827_v55  ;;  %v570_v46 = vpop.xlane.xlu0 %569  ;;  %1871 = vrsqrt.f32 %v875_v18 }
 0x1f3   :  { %v525_v32 = vpop.xlane.xlu1 %524  ;;  %1106 = vrot.lane.b32.xlu0 %v1016_v49, %s1932_s6  ;;  %1104 = vrot.lane.b32.xlu1 %v1015_v30, %s1932_s6  ;;  %v1866_v40 = vpop.eup %1865  ;;  %v2707_v55 = vmul.f32 0.0051020407, %v570_v46 }
 0x1f4   :  { %v891_v33 = vadd.f32 1e-05, %v859_v31  ;;  %v2709_v8 = vmul.f32 0.0051020407, %v525_v32  ;;  %v985_v22 = vmul.f32 %v1866_v40, %v2703_v38 }
 0x1f5   :  { %v828_v54 = vmul.f32 %v2707_v55, %v2707_v55 }
 0x1f6   :  { %v714_v37 = vpop.xlane.xlu0 %713  ;;  %1873 = vrsqrt.f32 %v891_v33  ;;  %v813_v11 = vmul.f32 %v2709_v8, %v2709_v8 }
 0x1f7   :  { %v573_v56 = vpop.xlane.xlu1 %572  ;;  %v780_v30 = vmul.f32 0.0051020407, %v714_v37  ;;  %1239 = vperm.xlu0 %1815, %v969_v43   ;;  %1234 = vperm.xlu1 %1816, %v968_v45  }
 0x1f8   :  { %v2711_v26 = vmul.f32 0.0051020407, %v573_v56  ;;  %v1001_v56 = vmul.f32 %v969_v43, %v2613_v34  ;;  %v1017_v43 = vmul.f32 %v985_v22, %v2615_v50 }
 0x1f9   :  { %v844_v18 = vsub.f32 %v780_v30, %v812_v13 }
 0x1fa   :  { %v1868_v31 = vpop.eup %1867  ;;  %v762_v49 = vpop.xlane.xlu0 %761  ;;  %v829_v33 = vmul.f32 %v2711_v26, %v2711_v26 }
 0x1fb   :  { %v717_v45 = vpop.xlane.xlu1 %716  ;;  %v876_v46 = vadd.f32 1e-05, %v844_v18  ;;  %v796_v32 = vmul.f32 0.0051020407, %v762_v49  ;;  %1319 = vperm.xlu0 %1815, %v985_v22   ;;  %1314 = vperm.xlu1 %1816, %v984_v25   ;;  %v970_v40 = vmul.f32 %v1868_v31, %v2717_v35 }
 0x1fc   :  { %v781_v37 = vmul.f32 0.0051020407, %v717_v45 }
 0x1fd   :  { %1875 = vrsqrt.f32 %v876_v46  ;;  %v860_v13 = vsub.f32 %v796_v32, %v828_v54  ;;  %v1002_v18 = vmul.f32 %v970_v40, %v2641_v29  ;;  %v2741_v29 = vld [vmem:[%s3020_s2 + $0x68] sm:$0xff] }
 0x1fe   :  { %v845_v30 = vsub.f32 %v781_v37, %v813_v11  ;;  %v1870_v49 = vpop.eup %1869 }
 0x1ff   :  { %v765_v45 = vpop.xlane.xlu1 %764  ;;  %v892_v25 = vadd.f32 1e-05, %v860_v13  ;;  %1078 = vrot.lane.b32.xlu0 %v1002_v18, %s1932_s6  ;;  %1076 = vrot.lane.b32.xlu1 %v1001_v56, %s1932_s6  ;;  %v986_v34 = vmul.f32 %v1870_v49, %v2730_v20  ;;  %v1872_v31 = vpop.eup %1871 }
 0x200   :  { %v797_v16 = vmul.f32 0.0051020407, %v765_v45  ;;  %v877_v27 = vadd.f32 1e-05, %v845_v30  ;;  %v971_v32 = vmul.f32 %v1872_v31, %v2741_v29 }
 0x201   :  { %1877 = vrsqrt.f32 %v892_v25  ;;  %v1018_v54 = vmul.f32 %v986_v34, %v2653_v60  ;;  %v2754_v60 = vld [vmem:[%s3020_s2 + $0x70] sm:$0xff]  ;;  %v2773_v25 = vld [vmem:[%s3020_s2 + $0x78] sm:$0xff] }
 0x202   :  { %v861_v46 = vsub.f32 %v797_v16, %v829_v33  ;;  %1879 = vrsqrt.f32 %v877_v27  ;;  %v2749_v16 = vld [vmem:[%s3020_s2 + $0xe8] sm:$0xff]  ;;  %v2761_v33 = vld [vmem:[%s3020_s2 + $0xf0] sm:$0xff]  ;;  %v1003_v56 = vmul.f32 %v971_v32, %v2655_v41 }
 0x203   :  { %1110 = vrot.lane.b32.xlu0 %v1018_v54, %s1932_s6  ;;  %1108 = vrot.lane.b32.xlu1 %v1017_v43, %s1932_s6  ;;  %v1874_v50 = vpop.eup %1873  ;;  %v1933_v54 = vmov 1  }
 0x204   :  { %v893_v11 = vadd.f32 1e-05, %v861_v46  ;;  %v987_v22 = vmul.f32 %v1874_v50, %v2749_v16 }
 0x206   :  { %1881 = vrsqrt.f32 %v893_v11  ;;  %v1019_v49 = vmul.f32 %v987_v22, %v2663_v12 }
 0x207   :  { %1249 = vperm.xlu0 %1815, %v971_v32   ;;  %1244 = vperm.xlu1 %1816, %v970_v40  }
 0x20a   :  { %v1876_v27 = vpop.eup %1875 }
 0x20b   :  { %1329 = vperm.xlu0 %1815, %v987_v22   ;;  %1324 = vperm.xlu1 %1816, %v986_v34   ;;  %v972_v37 = vmul.f32 %v1876_v27, %v2754_v60  ;;  %v2781_v34 = vld [vmem:[%s3020_s2 + $0xf8] sm:$0xff]  ;;  %s1934_s2 = smov [#allocation6]  }
 0x20d   :  { %v1004_v40 = vmul.f32 %v972_v37, %v2689_v24 }
 0x20e   :  { %v1878_v13 = vpop.eup %1877 }
 0x20f   :  { %1082 = vrot.lane.b32.xlu0 %v1004_v40, %s1932_s6  ;;  %1080 = vrot.lane.b32.xlu1 %v1003_v56, %s1932_s6  ;;  %v988_v30 = vmul.f32 %v1878_v13, %v2761_v33  ;;  %v1880_v45 = vpop.eup %1879 }
 0x210   :  { %v973_v41 = vmul.f32 %v1880_v45, %v2773_v25 }
 0x211   :  { %v1020_v18 = vmul.f32 %v988_v30, %v2707_v55 }
 0x212   :  { %v1005_v31 = vmul.f32 %v973_v41, %v2709_v8 }
 0x213   :  { %1114 = vrot.lane.b32.xlu0 %v1020_v18, %s1932_s6  ;;  %1112 = vrot.lane.b32.xlu1 %v1019_v49, %s1932_s6  ;;  %v1882_v24 = vpop.eup %1881 }
 0x214   :  { %v989_v55 = vmul.f32 %v1882_v24, %v2781_v34 }
 0x216   :  { %v1021_v50 = vmul.f32 %v989_v55, %v2711_v26 }
 0x217   :  { %1254 = vperm.xlu1 %1816, %v972_v37   ;;  %1259 = vperm.xlu0 %1815, %v973_v41  }
 0x218   :  { %v2783_v12 = vpop.permute.xlu0 %1184 }
 0x21b   :  { %1334 = vperm.xlu1 %1816, %v988_v30   ;;  %1339 = vperm.xlu0 %1815, %v989_v55  }
 0x21c   :  { %v1055_v43 = vpop.permute.xlu0 %1054  ;;  %v2787_v46 = vpop.permute.xlu1 %1264 }
 0x21d   :  { %v1150_v8 = vsub.f32 %v2432_v48, %v1055_v43 }
 0x21f   :  { %1084 = vrot.lane.b32.xlu1 %v1005_v31, %s1932_s6  ;;  %1818 = vset.pattern.permute.xlu0 %v1933_v54 }
 0x220   :  { %v1087_v11 = vpop.permute.xlu0 %1086  ;;  %1817 = vset.pattern.permute.xlu1 %v1933_v54 }
 0x221   :  { %v1166_v32 = vsub.f32 %v2444_v57, %v1087_v11 }
 0x222   :  { %v2792_v22 = vpop.permute.xlu1 %1189 }
 0x223   :  { %1488 = vperm.xlu0 %1818, %v1166_v32   ;;  %1116 = vrot.lane.b32.xlu1 %v1021_v50, %s1932_s6  ;;  %s1763_s6 = sshll.u32 %s1934_s2, 4  ;;  %s1764_s6 = int_to_ptr.vmem [resolvable:$true] %s1763_s6 }
 0x224   :  { %v2795_v27 = vpop.permute.xlu0 %1269  ;;  %s1903_s17 = scalar_lea.vmem %s1764_s6, 8192  ;;  %p1908_p6 = scmp.lt.s32.totalorder %s1764_s6, %s1764_s6 }
 0x225   :  { %p1904_p5 = scmp.ne.s32.totalorder %s1764_s6, %s1903_s17  ;;  %p1909_p7 = scmp.lt.s32.totalorder %s1903_s17, %s1903_s17 }
 0x226   :  { %v1057_v37 = vpop.permute.xlu1 %1056 }
 0x227   :  { %v1151_v40 = vsub.f32 %v2455_v58, %v1057_v37  ;;  %1408 = vperm.xlu1 %1817, %v1150_v8   ;;  %p1910_p8 = por %p1909_p7, %p1908_p6 }
 0x228   :  { %v1091_v56 = vpop.permute.xlu0 %1090 }
 0x229   :  { %1413 = vperm.xlu0 %1818, %v1151_v40   ;;  %v1168_v57 = vsub.f32 %v2484_v53, %v1091_v56  ;;  %p1911_p9 = pnand %p1910_p8, %p1904_p5 }
 0x22a   :  { %v1089_v13 = vpop.permute.xlu1 %1088 }
 0x22b   :  { %v1167_v26 = vsub.f32 %v2463_v19, %v1089_v13 }
 0x22d   :  { %1498 = vperm.xlu0 %1818, %v1168_v57   ;;  %1493 = vperm.xlu1 %1817, %v1167_v26  }
 0x22e   :  { %v2801_v30 = vpop.permute.xlu1 %1194 }
 0x232   :  { %v2803_v18 = vpop.permute.xlu0 %1199  ;;  %v2805_v49 = vpop.permute.xlu1 %1274 }
 0x236   :  { %v2807_v48 = vpop.permute.xlu0 %1279  ;;  %v1059_v45 = vpop.permute.xlu1 %1058 }
 0x237   :  { %v1152_v58 = vsub.f32 %v2491_v1, %v1059_v45 }
 0x239   :  { %1418 = vperm.xlu1 %1817, %v1152_v58  }
 0x23a   :  { %v1063_v41 = vpop.permute.xlu0 %1062  ;;  %v1061_v24 = vpop.permute.xlu1 %1060 }
 0x23b   :  { %v1154_v53 = vsub.f32 %v2524_v52, %v1063_v41  ;;  %v1153_v19 = vsub.f32 %v2502_v15, %v1061_v24 }
 0x23d   :  { %1428 = vperm.xlu0 %1818, %v1154_v53   ;;  %1423 = vperm.xlu1 %1817, %v1153_v19  }
 0x23e   :  { %v1095_v55 = vpop.permute.xlu0 %1094  ;;  %v1093_v43 = vpop.permute.xlu1 %1092 }
 0x23f   :  { %v1170_v31 = vsub.f32 %v2538_v63, %v1095_v55  ;;  %v1169_v54 = vsub.f32 %v2509_v6, %v1093_v43 }
 0x241   :  { %1508 = vperm.xlu0 %1818, %v1170_v31   ;;  %1503 = vperm.xlu1 %1817, %v1169_v54  }
 0x242   :  { %v2814_v11 = vpop.permute.xlu0 %1209  ;;  %v2816_v1 = vpop.permute.xlu1 %1204 }
 0x246   :  { %v2818_v32 = vpop.permute.xlu0 %1289  ;;  %v2820_v50 = vpop.permute.xlu1 %1284 }
 0x24a   :  { %v1067_v52 = vpop.permute.xlu0 %1066  ;;  %v1065_v15 = vpop.permute.xlu1 %1064 }
 0x24b   :  { %v1156_v8 = vsub.f32 %v2572_v36, %v1067_v52  ;;  %v1155_v37 = vsub.f32 %v2551_v23, %v1065_v15 }
 0x24d   :  { %1438 = vperm.xlu0 %1818, %v1156_v8   ;;  %1433 = vperm.xlu1 %1817, %v1155_v37  }
 0x24e   :  { %v1099_v63 = vpop.permute.xlu0 %1098  ;;  %v1097_v6 = vpop.permute.xlu1 %1096 }
 0x24f   :  { %v1172_v40 = vsub.f32 %v2586_v14, %v1099_v63  ;;  %v1171_v56 = vsub.f32 %v2565_v59, %v1097_v6 }
 0x251   :  { %1518 = vperm.xlu0 %1818, %v1172_v40   ;;  %1513 = vperm.xlu1 %1817, %v1171_v56  }
 0x252   :  { %v2826_v13 = vpop.permute.xlu0 %1219  ;;  %v2828_v57 = vpop.permute.xlu1 %1214 }
 0x256   :  { %v2830_v26 = vpop.permute.xlu0 %1299  ;;  %v2832_v45 = vpop.permute.xlu1 %1294 }
 0x25a   :  { %v1071_v36 = vpop.permute.xlu0 %1070  ;;  %v1069_v23 = vpop.permute.xlu1 %1068 }
 0x25b   :  { %v1158_v58 = vsub.f32 %v2621_v39, %v1071_v36  ;;  %v1157_v41 = vsub.f32 %v2599_v28, %v1069_v23 }
 0x25d   :  { %1448 = vperm.xlu0 %1818, %v1158_v58   ;;  %1443 = vperm.xlu1 %1817, %v1157_v41  }
 0x25e   :  { %v1103_v14 = vpop.permute.xlu0 %1102  ;;  %v1101_v59 = vpop.permute.xlu1 %1100 }
 0x25f   :  { %v1174_v24 = vsub.f32 %v2634_v51, %v1103_v14  ;;  %v1173_v53 = vsub.f32 %v2607_v62, %v1101_v59 }
 0x261   :  { %1528 = vperm.xlu0 %1818, %v1174_v24   ;;  %1523 = vperm.xlu1 %1817, %v1173_v53  }
 0x262   :  { %v2838_v19 = vpop.permute.xlu0 %1229  ;;  %v2840_v55 = vpop.permute.xlu1 %1224 }
 0x266   :  { %v2842_v43 = vpop.permute.xlu0 %1309  ;;  %v2844_v31 = vpop.permute.xlu1 %1304 }
 0x26a   :  { %v1075_v39 = vpop.permute.xlu0 %1074  ;;  %v1073_v28 = vpop.permute.xlu1 %1072 }
 0x26b   :  { %v1160_v54 = vsub.f32 %v2668_v42, %v1075_v39  ;;  %v1159_v52 = vsub.f32 %v2647_v61, %v1073_v28 }
 0x26d   :  { %1458 = vperm.xlu0 %1818, %v1160_v54   ;;  %1453 = vperm.xlu1 %1817, %v1159_v52  }
 0x26e   :  { %v1107_v51 = vpop.permute.xlu0 %1106  ;;  %v1105_v62 = vpop.permute.xlu1 %1104 }
 0x26f   :  { %v1176_v15 = vsub.f32 %v2682_v44, %v1107_v51  ;;  %v1175_v8 = vsub.f32 %v2661_v47, %v1105_v62 }
 0x271   :  { %1538 = vperm.xlu0 %1818, %v1176_v15   ;;  %1533 = vperm.xlu1 %1817, %v1175_v8   ;;  %v1374_v8 = vmul.f32 %v2787_v46, %v2091_v3 }
 0x272   :  { %v2850_v37 = vpop.permute.xlu0 %1239  ;;  %v2852_v63 = vpop.permute.xlu1 %1234 }
 0x276   :  { %v2854_v6 = vpop.permute.xlu0 %1319  ;;  %v2856_v40 = vpop.permute.xlu1 %1314 }
 0x27a   :  { %v1079_v42 = vpop.permute.xlu0 %1078  ;;  %v1077_v61 = vpop.permute.xlu1 %1076 }
 0x27b   :  { %v1162_v56 = vsub.f32 %v2717_v35, %v1079_v42  ;;  %v1161_v36 = vsub.f32 %v2695_v17, %v1077_v61 }
 0x27d   :  { %1468 = vperm.xlu0 %1818, %v1162_v56   ;;  %1463 = vperm.xlu1 %1817, %v1161_v36  }
 0x27e   :  { %v1111_v44 = vpop.permute.xlu0 %1110  ;;  %v1109_v47 = vpop.permute.xlu1 %1108 }
 0x27f   :  { %v1178_v23 = vsub.f32 %v2730_v20, %v1111_v44  ;;  %v1177_v58 = vsub.f32 %v2703_v38, %v1109_v47  ;;  %v1342_v44 = vmul.f32 %v2783_v12, %v2089_v2  ;;  %v1343_v47 = vmul.f32 %v2783_v12, %v2093_v4 }
 0x280   :  { %v1376_v4 = vmul.f32 %v2795_v27, %v2099_v7  ;;  %v1377_v12 = vmul.f32 %v2795_v27, %v2105_v9 }
 0x281   :  { %1548 = vperm.xlu0 %1818, %v1178_v23   ;;  %1543 = vperm.xlu1 %1817, %v1177_v58  }
 0x282   :  { %v2862_v41 = vpop.permute.xlu0 %1249  ;;  %v2864_v14 = vpop.permute.xlu1 %1244 }
 0x286   :  { %v2866_v59 = vpop.permute.xlu0 %1329  ;;  %v2868_v24 = vpop.permute.xlu1 %1324 }
 0x28a   :  { %v1083_v35 = vpop.permute.xlu0 %1082  ;;  %v1081_v17 = vpop.permute.xlu1 %1080 }
 0x28b   :  { %v1164_v53 = vsub.f32 %v2754_v60, %v1083_v35  ;;  %v1163_v39 = vsub.f32 %v2741_v29, %v1081_v17 }
 0x28d   :  { %1478 = vperm.xlu0 %1818, %v1164_v53   ;;  %1473 = vperm.xlu1 %1817, %v1163_v39  }
 0x28e   :  { %v1115_v20 = vpop.permute.xlu0 %1114  ;;  %v1113_v38 = vpop.permute.xlu1 %1112 }
 0x28f   :  { %v1180_v28 = vsub.f32 %v2761_v33, %v1115_v20  ;;  %v1179_v54 = vsub.f32 %v2749_v16, %v1113_v38  ;;  %v1375_v33 = vmul.f32 %v2787_v46, %v2095_v5  ;;  %v1344_v5 = vmul.f32 %v2792_v22, %v2101_v0  ;;  %v3132_v20 = vld [vmem:[#allocation12_spill] sm:$0xff] }
 0x290   :  { %v1345_v46 = vmul.f32 %v2792_v22, %v2107_v10  ;;  %v1378_v0 = vmul.f32 %v2805_v49, %v2127_v21  ;;  %v1379_v10 = vmul.f32 %v2805_v49, %v3132_v20  ;;  %v3133_v21 = vld [vmem:[#allocation9_spill] sm:$0xff] }
 0x291   :  { %1558 = vperm.xlu0 %1818, %v1180_v28   ;;  %1553 = vperm.xlu1 %1817, %v1179_v54   ;;  %v1346_v49 = vmul.f32 %v2801_v30, %v3133_v21 }
 0x292   :  { %v2874_v52 = vpop.permute.xlu1 %1254  ;;  %v2876_v51 = vpop.permute.xlu0 %1259 }
 0x296   :  { %v2878_v62 = vpop.permute.xlu1 %1334  ;;  %v2880_v15 = vpop.permute.xlu0 %1339 }
 0x29a   :  { %v1085_v60 = vpop.permute.xlu1 %1084 }
 0x29b   :  { %v1165_v29 = vsub.f32 %v2773_v25, %v1085_v60 }
 0x29d   :  { %1483 = vperm.xlu1 %1817, %v1165_v29  }
 0x29e   :  { %v1489_v16 = vpop.permute.xlu0 %1488  ;;  %v1117_v42 = vpop.permute.xlu1 %1116 }
 0x29f   :  { %v1598_v61 = vadd.f32 %v1489_v16, %v1374_v8  ;;  %v1599_v56 = vadd.f32 %v1489_v16, %v1375_v33  ;;  %v1181_v36 = vsub.f32 %v2781_v34, %v1117_v42  ;;  %v3134_v42 = vld [vmem:[#allocation10_spill] sm:$0xff] }
 0x2a1   :  { %v1662_v25 = vmax.f32 %v1598_v61, 0.0  ;;  %v1663_v23 = vmax.f32 %v1599_v56, 0.0  ;;  %1563 = vperm.xlu1 %1817, %v1181_v36   ;;  %v1347_v61 = vmul.f32 %v2801_v30, %v3134_v42 }
 0x2a2   :  { %v1409_v3 = vpop.permute.xlu1 %1408 }
 0x2a3   :  { %1726 = vst [vmem:[#allocation6 + $0x100] sm:$0xff] %v1662_v25  ;;  %1727 = vst [vmem:[#allocation6 + $0x108] sm:$0xff] %v1663_v23  ;;  %v1566_v58 = vadd.f32 %v1409_v3, %v1342_v44  ;;  %v1567_v34 = vadd.f32 %v1409_v3, %v1343_v47  ;;  %v3135_v47 = vld [vmem:[#allocation11_spill] sm:$0xff]  ;;  %v3136_v23 = vld [vmem:[#allocation13_spill] sm:$0xff] }
 0x2a4   :  { %v1414_v35 = vpop.permute.xlu0 %1413  ;;  %v1348_v25 = vmul.f32 %v2803_v18, %v3135_v47  ;;  %v1349_v3 = vmul.f32 %v2803_v18, %v3136_v23  ;;  %v3140_v18 = vld [vmem:[#allocation15_spill] sm:$0xff]  ;;  %v3145_v47 = vld [vmem:[#allocation24_spill] sm:$0xff]  ;;  %v3146_v23 = vld [vmem:[#allocation25_spill] sm:$0xff] }
 0x2a5   :  { %v1630_v17 = vmax.f32 %v1566_v58, 0.0  ;;  %v1631_v2 = vmax.f32 %v1567_v34, 0.0  ;;  %v1568_v53 = vadd.f32 %v1414_v35, %v1344_v5  ;;  %v1569_v39 = vadd.f32 %v1414_v35, %v1345_v46  ;;  %v3137_v5 = vld [vmem:[#allocation16_spill] sm:$0xff]  ;;  %v3138_v58 = vld [vmem:[#allocation17_spill] sm:$0xff] }
 0x2a6   :  { %v1350_v46 = vmul.f32 %v2816_v1, %v3137_v5  ;;  %v1351_v34 = vmul.f32 %v2816_v1, %v3138_v58  ;;  %v3142_v1 = vld [vmem:[#allocation20_spill] sm:$0xff] }
 0x2a7   :  { %1694 = vst [vmem:[#allocation6] sm:$0xff] %v1630_v17  ;;  %1695 = vst [vmem:[#allocation6 + $0x8] sm:$0xff] %v1631_v2  ;;  %v1632_v22 = vmax.f32 %v1568_v53, 0.0  ;;  %v1633_v38 = vmax.f32 %v1569_v39, 0.0 }
 0x2a8   :  { %v1499_v28 = vpop.permute.xlu0 %1498  ;;  %v1494_v54 = vpop.permute.xlu1 %1493 }
 0x2a9   :  { %1696 = vst [vmem:[#allocation6 + $0x10] sm:$0xff] %v1632_v22  ;;  %1697 = vst [vmem:[#allocation6 + $0x18] sm:$0xff] %v1633_v38  ;;  %v1602_v60 = vadd.f32 %v1499_v28, %v1378_v0  ;;  %v1603_v29 = vadd.f32 %v1499_v28, %v1379_v10  ;;  %v1600_v7 = vadd.f32 %v1494_v54, %v1376_v4  ;;  %v3139_v0 = vld [vmem:[#allocation14_spill] sm:$0xff] }
 0x2aa   :  { %v1601_v8 = vadd.f32 %v1494_v54, %v1377_v12  ;;  %v1380_v20 = vmul.f32 %v2807_v48, %v3139_v0  ;;  %v1381_v10 = vmul.f32 %v2807_v48, %v3140_v18  ;;  %v3141_v22 = vld [vmem:[#allocation18_spill] sm:$0xff]  ;;  %v1383_v28 = vmul.f32 %v2820_v50, %v3142_v1 }
 0x2ab   :  { %v1666_v33 = vmax.f32 %v1602_v60, 0.0  ;;  %v1667_v9 = vmax.f32 %v1603_v29, 0.0  ;;  %v1664_v27 = vmax.f32 %v1600_v7, 0.0  ;;  %v1382_v38 = vmul.f32 %v2820_v50, %v3141_v22  ;;  %v3143_v50 = vld [vmem:[#allocation19_spill] sm:$0xff] }
 0x2ac   :  { %v1665_v16 = vmax.f32 %v1601_v8, 0.0 }
 0x2ad   :  { %1730 = vst [vmem:[#allocation6 + $0x120] sm:$0xff] %v1666_v33  ;;  %1731 = vst [vmem:[#allocation6 + $0x128] sm:$0xff] %v1667_v9 }
 0x2ae   :  { %1728 = vst [vmem:[#allocation6 + $0x110] sm:$0xff] %v1664_v27  ;;  %1729 = vst [vmem:[#allocation6 + $0x118] sm:$0xff] %v1665_v16 }
 0x2b4   :  { %v1419_v56 = vpop.permute.xlu1 %1418 }
 0x2b5   :  { %v1570_v36 = vadd.f32 %v1419_v56, %v1346_v49  ;;  %v1571_v44 = vadd.f32 %v1419_v56, %v1347_v61  ;;  %v1352_v56 = vmul.f32 %v2814_v11, %v3143_v50 }
 0x2b7   :  { %v1634_v35 = vmax.f32 %v1570_v36, 0.0  ;;  %v1635_v17 = vmax.f32 %v1571_v44, 0.0  ;;  %v3144_v36 = vld [vmem:[#allocation21_spill] sm:$0xff] }
 0x2b8   :  { %v1429_v2 = vpop.permute.xlu0 %1428  ;;  %v1424_v53 = vpop.permute.xlu1 %1423  ;;  %v1353_v44 = vmul.f32 %v2814_v11, %v3144_v36 }
 0x2b9   :  { %1698 = vst [vmem:[#allocation6 + $0x20] sm:$0xff] %v1634_v35  ;;  %1699 = vst [vmem:[#allocation6 + $0x28] sm:$0xff] %v1635_v17  ;;  %v1574_v30 = vadd.f32 %v1429_v2, %v1350_v46  ;;  %v1575_v39 = vadd.f32 %v1429_v2, %v1351_v34  ;;  %v1572_v4 = vadd.f32 %v1424_v53, %v1348_v25  ;;  %v3147_v2 = vld [vmem:[#allocation22_spill] sm:$0xff] }
 0x2ba   :  { %v1573_v12 = vadd.f32 %v1424_v53, %v1349_v3  ;;  %v1354_v25 = vmul.f32 %v2828_v57, %v3145_v47  ;;  %v1355_v3 = vmul.f32 %v2828_v57, %v3146_v23  ;;  %v1384_v53 = vmul.f32 %v2818_v32, %v3147_v2  ;;  %v3155_v47 = vld [vmem:[#allocation30_spill] sm:$0xff]  ;;  %v3156_v23 = vld [vmem:[#allocation31_spill] sm:$0xff] }
 0x2bb   :  { %v1638_v54 = vmax.f32 %v1574_v30, 0.0  ;;  %v1639_v60 = vmax.f32 %v1575_v39, 0.0  ;;  %v1636_v29 = vmax.f32 %v1572_v4, 0.0  ;;  %v3148_v30 = vld [vmem:[#allocation23_spill] sm:$0xff]  ;;  %v3149_v4 = vld [vmem:[#allocation26_spill] sm:$0xff] }
 0x2bc   :  { %v1637_v7 = vmax.f32 %v1573_v12, 0.0  ;;  %v1509_v8 = vpop.permute.xlu0 %1508  ;;  %v1504_v33 = vpop.permute.xlu1 %1503  ;;  %v1385_v39 = vmul.f32 %v2818_v32, %v3148_v30  ;;  %v1386_v11 = vmul.f32 %v2832_v45, %v3149_v4  ;;  %v3150_v12 = vld [vmem:[#allocation28_spill] sm:$0xff] }
 0x2bd   :  { %1702 = vst [vmem:[#allocation6 + $0x40] sm:$0xff] %v1638_v54  ;;  %1703 = vst [vmem:[#allocation6 + $0x48] sm:$0xff] %v1639_v60  ;;  %v1606_v9 = vadd.f32 %v1509_v8, %v1382_v38  ;;  %v1607_v27 = vadd.f32 %v1509_v8, %v1383_v28  ;;  %v1604_v16 = vadd.f32 %v1504_v33, %v1380_v20 }
 0x2be   :  { %1700 = vst [vmem:[#allocation6 + $0x30] sm:$0xff] %v1636_v29  ;;  %1701 = vst [vmem:[#allocation6 + $0x38] sm:$0xff] %v1637_v7  ;;  %v1605_v48 = vadd.f32 %v1504_v33, %v1381_v10  ;;  %v1387_v0 = vmul.f32 %v2832_v45, %v3150_v12  ;;  %v3151_v45 = vld [vmem:[#allocation27_spill] sm:$0xff] }
 0x2bf   :  { %v1670_v21 = vmax.f32 %v1606_v9, 0.0  ;;  %v1671_v49 = vmax.f32 %v1607_v27, 0.0  ;;  %v1668_v42 = vmax.f32 %v1604_v16, 0.0  ;;  %v1356_v33 = vmul.f32 %v2826_v13, %v3151_v45  ;;  %v3152_v9 = vld [vmem:[#allocation29_spill] sm:$0xff]  ;;  %v3153_v16 = vld [vmem:[#allocation32_spill] sm:$0xff]  ;;  %v3163_v45 = vld [vmem:[#allocation38_spill] sm:$0xff] }
 0x2c0   :  { %v1669_v61 = vmax.f32 %v1605_v48, 0.0  ;;  %v1357_v27 = vmul.f32 %v2826_v13, %v3152_v9  ;;  %v1358_v48 = vmul.f32 %v2840_v55, %v3153_v16  ;;  %v3164_v9 = vld [vmem:[#allocation39_spill] sm:$0xff]  ;;  %v3165_v16 = vld [vmem:[#allocation42_spill] sm:$0xff] }
 0x2c1   :  { %1734 = vst [vmem:[#allocation6 + $0x140] sm:$0xff] %v1670_v21  ;;  %1735 = vst [vmem:[#allocation6 + $0x148] sm:$0xff] %v1671_v49  ;;  %v3154_v21 = vld [vmem:[#allocation33_spill] sm:$0xff] }
 0x2c2   :  { %1732 = vst [vmem:[#allocation6 + $0x130] sm:$0xff] %v1668_v42  ;;  %1733 = vst [vmem:[#allocation6 + $0x138] sm:$0xff] %v1669_v61  ;;  %v1359_v49 = vmul.f32 %v2840_v55, %v3154_v21 }
 0x2c8   :  { %v1439_v5 = vpop.permute.xlu0 %1438  ;;  %v1434_v46 = vpop.permute.xlu1 %1433 }
 0x2c9   :  { %v1578_v58 = vadd.f32 %v1439_v5, %v1354_v25  ;;  %v1579_v34 = vadd.f32 %v1439_v5, %v1355_v3  ;;  %v1576_v35 = vadd.f32 %v1434_v46, %v1352_v56  ;;  %v1577_v17 = vadd.f32 %v1434_v46, %v1353_v44  ;;  %v3157_v5 = vld [vmem:[#allocation34_spill] sm:$0xff]  ;;  %v3158_v46 = vld [vmem:[#allocation36_spill] sm:$0xff] }
 0x2ca   :  { %v1388_v25 = vmul.f32 %v2830_v26, %v3155_v47  ;;  %v1389_v3 = vmul.f32 %v2830_v26, %v3156_v23  ;;  %v1390_v13 = vmul.f32 %v2844_v31, %v3157_v5 }
 0x2cb   :  { %v1642_v20 = vmax.f32 %v1578_v58, 0.0  ;;  %v1643_v57 = vmax.f32 %v1579_v34, 0.0  ;;  %v1640_v18 = vmax.f32 %v1576_v35, 0.0  ;;  %v1641_v10 = vmax.f32 %v1577_v17, 0.0 }
 0x2cc   :  { %v1519_v22 = vpop.permute.xlu0 %1518  ;;  %v1514_v38 = vpop.permute.xlu1 %1513  ;;  %v1391_v58 = vmul.f32 %v2844_v31, %v3158_v46  ;;  %v3159_v31 = vld [vmem:[#allocation35_spill] sm:$0xff]  ;;  %v3168_v46 = vld [vmem:[#allocation45_spill] sm:$0xff] }
 0x2cd   :  { %1706 = vst [vmem:[#allocation6 + $0x60] sm:$0xff] %v1642_v20  ;;  %1707 = vst [vmem:[#allocation6 + $0x68] sm:$0xff] %v1643_v57  ;;  %v1610_v1 = vadd.f32 %v1519_v22, %v1386_v11  ;;  %v1611_v28 = vadd.f32 %v1519_v22, %v1387_v0  ;;  %v1608_v54 = vadd.f32 %v1514_v38, %v1384_v53  ;;  %v3161_v22 = vld [vmem:[#allocation40_spill] sm:$0xff] }
 0x2ce   :  { %1704 = vst [vmem:[#allocation6 + $0x50] sm:$0xff] %v1640_v18  ;;  %1705 = vst [vmem:[#allocation6 + $0x58] sm:$0xff] %v1641_v10  ;;  %v1609_v32 = vadd.f32 %v1514_v38, %v1385_v39  ;;  %v1360_v57 = vmul.f32 %v2838_v19, %v3159_v31  ;;  %v3160_v18 = vld [vmem:[#allocation37_spill] sm:$0xff]  ;;  %v1362_v38 = vmul.f32 %v2852_v63, %v3161_v22  ;;  %v3173_v31 = vld [vmem:[#allocation50_spill] sm:$0xff] }
 0x2cf   :  { %v1674_v60 = vmax.f32 %v1610_v1, 0.0  ;;  %v1675_v29 = vmax.f32 %v1611_v28, 0.0  ;;  %v1672_v7 = vmax.f32 %v1608_v54, 0.0  ;;  %v1361_v10 = vmul.f32 %v2838_v19, %v3160_v18  ;;  %v3162_v1 = vld [vmem:[#allocation41_spill] sm:$0xff] }
 0x2d0   :  { %v1673_v8 = vmax.f32 %v1609_v32, 0.0  ;;  %v1363_v28 = vmul.f32 %v2852_v63, %v3162_v1  ;;  %v1394_v19 = vmul.f32 %v2856_v40, %v3165_v16  ;;  %v3177_v16 = vld [vmem:[#allocation56_spill] sm:$0xff] }
 0x2d1   :  { %1738 = vst [vmem:[#allocation6 + $0x160] sm:$0xff] %v1674_v60  ;;  %1739 = vst [vmem:[#allocation6 + $0x168] sm:$0xff] %v1675_v29 }
 0x2d2   :  { %1736 = vst [vmem:[#allocation6 + $0x150] sm:$0xff] %v1672_v7  ;;  %1737 = vst [vmem:[#allocation6 + $0x158] sm:$0xff] %v1673_v8 }
 0x2d8   :  { %v1449_v42 = vpop.permute.xlu0 %1448  ;;  %v1444_v61 = vpop.permute.xlu1 %1443 }
 0x2d9   :  { %v1582_v50 = vadd.f32 %v1449_v42, %v1358_v48  ;;  %v1583_v56 = vadd.f32 %v1449_v42, %v1359_v49  ;;  %v1580_v36 = vadd.f32 %v1444_v61, %v1356_v33  ;;  %v1581_v44 = vadd.f32 %v1444_v61, %v1357_v27  ;;  %v3166_v48 = vld [vmem:[#allocation44_spill] sm:$0xff] }
 0x2da   :  { %v1392_v33 = vmul.f32 %v2842_v43, %v3163_v45  ;;  %v1393_v27 = vmul.f32 %v2842_v43, %v3164_v9  ;;  %v1395_v21 = vmul.f32 %v2856_v40, %v3166_v48  ;;  %v3167_v40 = vld [vmem:[#allocation43_spill] sm:$0xff]  ;;  %v3176_v9 = vld [vmem:[#allocation53_spill] sm:$0xff] }
 0x2db   :  { %v1646_v34 = vmax.f32 %v1582_v50, 0.0  ;;  %v1647_v55 = vmax.f32 %v1583_v56, 0.0  ;;  %v1644_v35 = vmax.f32 %v1580_v36, 0.0  ;;  %v1645_v17 = vmax.f32 %v1581_v44, 0.0  ;;  %v3178_v48 = vld [vmem:[#allocation57_spill] sm:$0xff] }
 0x2dc   :  { %v1529_v2 = vpop.permute.xlu0 %1528  ;;  %v1524_v53 = vpop.permute.xlu1 %1523 }
 0x2dd   :  { %1710 = vst [vmem:[#allocation6 + $0x80] sm:$0xff] %v1646_v34  ;;  %1711 = vst [vmem:[#allocation6 + $0x88] sm:$0xff] %v1647_v55  ;;  %v1614_v30 = vadd.f32 %v1529_v2, %v1390_v13  ;;  %v1615_v39 = vadd.f32 %v1529_v2, %v1391_v58  ;;  %v1612_v4 = vadd.f32 %v1524_v53, %v1388_v25  ;;  %v3169_v34 = vld [vmem:[#allocation48_spill] sm:$0xff] }
 0x2de   :  { %1708 = vst [vmem:[#allocation6 + $0x70] sm:$0xff] %v1644_v35  ;;  %1709 = vst [vmem:[#allocation6 + $0x78] sm:$0xff] %v1645_v17  ;;  %v1613_v26 = vadd.f32 %v1524_v53, %v1389_v3  ;;  %v1364_v13 = vmul.f32 %v2850_v37, %v3167_v40  ;;  %v1365_v58 = vmul.f32 %v2850_v37, %v3168_v46  ;;  %v3170_v35 = vld [vmem:[#allocation49_spill] sm:$0xff] }
 0x2df   :  { %v1678_v11 = vmax.f32 %v1614_v30, 0.0  ;;  %v1679_v12 = vmax.f32 %v1615_v39, 0.0  ;;  %v1676_v0 = vmax.f32 %v1612_v4, 0.0  ;;  %v1366_v55 = vmul.f32 %v2864_v14, %v3169_v34 }
 0x2e0   :  { %v1677_v20 = vmax.f32 %v1613_v26, 0.0  ;;  %v1367_v17 = vmul.f32 %v2864_v14, %v3170_v35  ;;  %v1398_v37 = vmul.f32 %v2868_v24, %v3173_v31 }
 0x2e1   :  { %1742 = vst [vmem:[#allocation6 + $0x180] sm:$0xff] %v1678_v11  ;;  %1743 = vst [vmem:[#allocation6 + $0x188] sm:$0xff] %v1679_v12  ;;  %v3171_v11 = vld [vmem:[#allocation46_spill] sm:$0xff] }
 0x2e2   :  { %1740 = vst [vmem:[#allocation6 + $0x170] sm:$0xff] %v1676_v0  ;;  %1741 = vst [vmem:[#allocation6 + $0x178] sm:$0xff] %v1677_v20  ;;  %v1396_v12 = vmul.f32 %v2854_v6, %v3171_v11  ;;  %v3172_v0 = vld [vmem:[#allocation47_spill] sm:$0xff] }
 0x2e3   :  { %v1397_v20 = vmul.f32 %v2854_v6, %v3172_v0 }
 0x2e8   :  { %v1459_v54 = vpop.permute.xlu0 %1458  ;;  %v1454_v32 = vpop.permute.xlu1 %1453 }
 0x2e9   :  { %v1586_v60 = vadd.f32 %v1459_v54, %v1362_v38  ;;  %v1587_v29 = vadd.f32 %v1459_v54, %v1363_v28  ;;  %v1584_v7 = vadd.f32 %v1454_v32, %v1360_v57  ;;  %v1585_v8 = vadd.f32 %v1454_v32, %v1361_v10  ;;  %v3174_v57 = vld [vmem:[#allocation52_spill] sm:$0xff] }
 0x2ea   :  { %v1399_v18 = vmul.f32 %v2868_v24, %v3174_v57  ;;  %v3175_v24 = vld [vmem:[#allocation51_spill] sm:$0xff] }
 0x2eb   :  { %v1650_v49 = vmax.f32 %v1586_v60, 0.0  ;;  %v1651_v63 = vmax.f32 %v1587_v29, 0.0  ;;  %v1648_v42 = vmax.f32 %v1584_v7, 0.0  ;;  %v1649_v61 = vmax.f32 %v1585_v8, 0.0 }
 0x2ec   :  { %v1539_v50 = vpop.permute.xlu0 %1538  ;;  %v1534_v56 = vpop.permute.xlu1 %1533 }
 0x2ed   :  { %1714 = vst [vmem:[#allocation6 + $0xa0] sm:$0xff] %v1650_v49  ;;  %1715 = vst [vmem:[#allocation6 + $0xa8] sm:$0xff] %v1651_v63  ;;  %v1618_v36 = vadd.f32 %v1539_v50, %v1394_v19  ;;  %v1619_v44 = vadd.f32 %v1539_v50, %v1395_v21  ;;  %v1616_v47 = vadd.f32 %v1534_v56, %v1392_v33 }
 0x2ee   :  { %1712 = vst [vmem:[#allocation6 + $0x90] sm:$0xff] %v1648_v42  ;;  %1713 = vst [vmem:[#allocation6 + $0x98] sm:$0xff] %v1649_v61  ;;  %v1617_v43 = vadd.f32 %v1534_v56, %v1393_v27  ;;  %v1368_v33 = vmul.f32 %v2862_v41, %v3175_v24  ;;  %v1369_v27 = vmul.f32 %v2862_v41, %v3176_v9 }
 0x2ef   :  { %v1682_v25 = vmax.f32 %v1618_v36, 0.0  ;;  %v1683_v23 = vmax.f32 %v1619_v44, 0.0  ;;  %v1680_v3 = vmax.f32 %v1616_v47, 0.0  ;;  %v1370_v19 = vmul.f32 %v2874_v52, %v3177_v16  ;;  %v3179_v36 = vld [vmem:[#allocation54_spill] sm:$0xff]  ;;  %v3180_v47 = vld [vmem:[#allocation55_spill] sm:$0xff] }
 0x2f0   :  { %v1681_v5 = vmax.f32 %v1617_v43, 0.0  ;;  %v1371_v21 = vmul.f32 %v2874_v52, %v3178_v48  ;;  %v1400_v44 = vmul.f32 %v2866_v59, %v3179_v36  ;;  %v1401_v43 = vmul.f32 %v2866_v59, %v3180_v47 }
 0x2f1   :  { %1746 = vst [vmem:[#allocation6 + $0x1a0] sm:$0xff] %v1682_v25  ;;  %1747 = vst [vmem:[#allocation6 + $0x1a8] sm:$0xff] %v1683_v23  ;;  %v3181_v25 = vld [vmem:[#allocation58_spill] sm:$0xff]  ;;  %v3182_v23 = vld [vmem:[#allocation60_spill] sm:$0xff] }
 0x2f2   :  { %1744 = vst [vmem:[#allocation6 + $0x190] sm:$0xff] %v1680_v3  ;;  %1745 = vst [vmem:[#allocation6 + $0x198] sm:$0xff] %v1681_v5  ;;  %v1402_v41 = vmul.f32 %v2878_v62, %v3181_v25  ;;  %v1403_v3 = vmul.f32 %v2878_v62, %v3182_v23  ;;  %v3183_v62 = vld [vmem:[#allocation59_spill] sm:$0xff] }
 0x2f8   :  { %v1469_v2 = vpop.permute.xlu0 %1468  ;;  %v1464_v53 = vpop.permute.xlu1 %1463 }
 0x2f9   :  { %v1590_v30 = vadd.f32 %v1469_v2, %v1366_v55  ;;  %v1591_v39 = vadd.f32 %v1469_v2, %v1367_v17  ;;  %v1588_v4 = vadd.f32 %v1464_v53, %v1364_v13  ;;  %v1589_v26 = vadd.f32 %v1464_v53, %v1365_v58 }
 0x2fb   :  { %v1654_v10 = vmax.f32 %v1590_v30, 0.0  ;;  %v1655_v14 = vmax.f32 %v1591_v39, 0.0  ;;  %v1652_v22 = vmax.f32 %v1588_v4, 0.0  ;;  %v1653_v38 = vmax.f32 %v1589_v26, 0.0  ;;  %v3184_v4 = vld [vmem:[#allocation61_spill] sm:$0xff] }
 0x2fc   :  { %v1549_v1 = vpop.permute.xlu0 %1548  ;;  %v1544_v28 = vpop.permute.xlu1 %1543  ;;  %v1372_v39 = vmul.f32 %v2876_v51, %v3183_v62  ;;  %v1373_v26 = vmul.f32 %v2876_v51, %v3184_v4 }
 0x2fd   :  { %1718 = vst [vmem:[#allocation6 + $0xc0] sm:$0xff] %v1654_v10  ;;  %1719 = vst [vmem:[#allocation6 + $0xc8] sm:$0xff] %v1655_v14  ;;  %v1622_v54 = vadd.f32 %v1549_v1, %v1398_v37  ;;  %v1623_v32 = vadd.f32 %v1549_v1, %v1399_v18  ;;  %v1620_v60 = vadd.f32 %v1544_v28, %v1396_v12  ;;  %v3186_v37 = vld [vmem:[#allocation63_spill] sm:$0xff] }
 0x2fe   :  { %1716 = vst [vmem:[#allocation6 + $0xb0] sm:$0xff] %v1652_v22  ;;  %1717 = vst [vmem:[#allocation6 + $0xb8] sm:$0xff] %v1653_v38  ;;  %v1621_v6 = vadd.f32 %v1544_v28, %v1397_v20  ;;  %v3185_v20 = vld [vmem:[#allocation62_spill] sm:$0xff]  ;;  %v1405_v57 = vmul.f32 %v2880_v15, %v3186_v37 }
 0x2ff   :  { %v1686_v29 = vmax.f32 %v1622_v54, 0.0  ;;  %v1687_v7 = vmax.f32 %v1623_v32, 0.0  ;;  %v1684_v8 = vmax.f32 %v1620_v60, 0.0  ;;  %v1404_v31 = vmul.f32 %v2880_v15, %v3185_v20 }
 0x300   :  { %v1685_v45 = vmax.f32 %v1621_v6, 0.0 }
 0x301   :  { %1750 = vst [vmem:[#allocation6 + $0x1c0] sm:$0xff] %v1686_v29  ;;  %1751 = vst [vmem:[#allocation6 + $0x1c8] sm:$0xff] %v1687_v7 }
 0x302   :  { %1748 = vst [vmem:[#allocation6 + $0x1b0] sm:$0xff] %v1684_v8  ;;  %1749 = vst [vmem:[#allocation6 + $0x1b8] sm:$0xff] %v1685_v45 }
 0x308   :  { %v1479_v49 = vpop.permute.xlu0 %1478  ;;  %v1474_v63 = vpop.permute.xlu1 %1473 }
 0x309   :  { %v1594_v42 = vadd.f32 %v1479_v49, %v1370_v19  ;;  %v1595_v61 = vadd.f32 %v1479_v49, %v1371_v21  ;;  %v1592_v50 = vadd.f32 %v1474_v63, %v1368_v33  ;;  %v1593_v56 = vadd.f32 %v1474_v63, %v1369_v27 }
 0x30b   :  { %v1658_v5 = vmax.f32 %v1594_v42, 0.0  ;;  %v1659_v52 = vmax.f32 %v1595_v61, 0.0  ;;  %v1656_v40 = vmax.f32 %v1592_v50, 0.0  ;;  %v1657_v13 = vmax.f32 %v1593_v56, 0.0 }
 0x30c   :  { %v1559_v46 = vpop.permute.xlu0 %1558  ;;  %v1554_v58 = vpop.permute.xlu1 %1553 }
 0x30d   :  { %1722 = vst [vmem:[#allocation6 + $0xe0] sm:$0xff] %v1658_v5  ;;  %1723 = vst [vmem:[#allocation6 + $0xe8] sm:$0xff] %v1659_v52  ;;  %v1626_v34 = vadd.f32 %v1559_v46, %v1402_v41  ;;  %v1627_v55 = vadd.f32 %v1559_v46, %v1403_v3  ;;  %v1624_v35 = vadd.f32 %v1554_v58, %v1400_v44 }
 0x30e   :  { %1720 = vst [vmem:[#allocation6 + $0xd0] sm:$0xff] %v1656_v40  ;;  %1721 = vst [vmem:[#allocation6 + $0xd8] sm:$0xff] %v1657_v13  ;;  %v1625_v59 = vadd.f32 %v1554_v58, %v1401_v43 }
 0x30f   :  { %v1690_v17 = vmax.f32 %v1626_v34, 0.0  ;;  %v1691_v2 = vmax.f32 %v1627_v55, 0.0  ;;  %v1688_v53 = vmax.f32 %v1624_v35, 0.0 }
 0x310   :  { %v1689_v30 = vmax.f32 %v1625_v59, 0.0 }
 0x311   :  { %1754 = vst [vmem:[#allocation6 + $0x1e0] sm:$0xff] %v1690_v17  ;;  %1755 = vst [vmem:[#allocation6 + $0x1e8] sm:$0xff] %v1691_v2 }
 0x312   :  { %1752 = vst [vmem:[#allocation6 + $0x1d0] sm:$0xff] %v1688_v53  ;;  %1753 = vst [vmem:[#allocation6 + $0x1d8] sm:$0xff] %v1689_v30 }
 0x318   :  { %v1484_v11 = vpop.permute.xlu1 %1483 }
 0x319   :  { %v1596_v12 = vadd.f32 %v1484_v11, %v1372_v39  ;;  %v1597_v0 = vadd.f32 %v1484_v11, %v1373_v26 }
 0x31b   :  { %v1660_v18 = vmax.f32 %v1596_v12, 0.0  ;;  %v1661_v10 = vmax.f32 %v1597_v0, 0.0 }
 0x31c   :  { %v1564_v14 = vpop.permute.xlu1 %1563 }
 0x31d   :  { %1724 = vst [vmem:[#allocation6 + $0xf0] sm:$0xff] %v1660_v18  ;;  %1725 = vst [vmem:[#allocation6 + $0xf8] sm:$0xff] %v1661_v10  ;;  %v1628_v22 = vadd.f32 %v1564_v14, %v1404_v31  ;;  %v1629_v38 = vadd.f32 %v1564_v14, %v1405_v57 }
 0x31f   :  { %v1692_v1 = vmax.f32 %v1628_v22, 0.0  ;;  %v1693_v51 = vmax.f32 %v1629_v38, 0.0 }
 0x321   :  { %1756 = vst [vmem:[#allocation6 + $0x1f0] sm:$0xff] %v1692_v1  ;;  %1757 = vst [vmem:[#allocation6 + $0x1f8] sm:$0xff] %v1693_v51 }
 0x322   :  { %1914 = shalt.err (!%p1911_p9)
}
 0x323   :  { %1769 = dma.vmem_to_hbm [thread:$0]  %s1764_s6, 8192, %s3021_s3, [#allocation5], %s1928_s15, %s1928_s15, %s1929_s16  }
 0x324   :  { %1925 = dma.done.wait [#allocation5], 8192  }
 0x325   :  { %1926 = vsyncadd [#allocation5], 4294959104 }
 0x326   :  { %1773 = vsyncpa [#allocation4], 1 }
 0x327   :  { %1774 = vsyncpa [#allocation5], 1 }

</bundles_post_ra>
